<compile_context>
chip_gen: v5e
topology: v5e:2x2
jax: 0.10.0
libtpu: 0.0.40
codegen_flags: <defaults>
</compile_context>

<pallas_src>
import jax
import jax.numpy as jnp
from jax.experimental import pallas as pl
from jax.experimental.pallas import tpu as pltpu

# ----------------------------- config --------------------------------------
B, C, IMG, P = 2, 3, 16, 8          # batch, channels, image size, patch size
H = 32                              # hidden size
NH = 2                              # attention heads
HD = H // NH                        # head dim
MLP = 64                            # MLP intermediate size
LAYERS = 2                          # encoder layers
GRIDP = IMG // P                    # patches per side
N = GRIDP * GRIDP                   # num patches
T = N + 1                           # tokens (+CLS)
BT = B * T                          # batch folded into rows
CPP = C * P * P                     # flattened patch length
HEAD_PAD = 128                      # lane-padded merged head output (reg:3, bin:1, pad)
EPS = 1e-6


# ------------------------- fused pallas kernel ------------------------------
def _layernorm(v, g, b):
    mu = jnp.mean(v, axis=-1, keepdims=True)
    var = jnp.mean((v - mu) ** 2, axis=-1, keepdims=True)
    return (v - mu) * jax.lax.rsqrt(var + EPS) * g + b


def _vit_fused_kernel(patches_ref, patch_w_ref, patch_b_ref, cls_pos_ref,
                      mask_ref,
                      ln1_g_ref, ln1_b_ref,
                      wq_ref, wk_ref, wv_ref, bq_ref, bk_ref, bv_ref,
                      wo_ref, bo_ref,
                      ln2_g_ref, ln2_b_ref,
                      w1_ref, bm1_ref, w2_ref, bm2_ref,
                      lnf_g_ref, lnf_b_ref, head_w_ref, head_b_ref,
                      out_ref):
    f32 = jnp.float32

    # --- patch embedding (conv with kernel == stride == P as a matmul) ---
    emb = (jnp.dot(patches_ref[...], patch_w_ref[...],
                   preferred_element_type=f32) + patch_b_ref[...])      # (B*N, H)

    # --- CLS + positional embedding; fold batch into rows: (B*T, H) ---
    cls_pos = cls_pos_ref[...]                                          # (T, H)
    rows = []
    for b in range(B):                                                  # static
        rows.append(cls_pos[0:1, :])                                    # CLS row
        rows.append(emb[b * N:(b + 1) * N, :] + cls_pos[1:, :])
    x = jnp.concatenate(rows, axis=0)                                   # (BT, H)

    mask = mask_ref[...]                                                # (BT, BT) block-diag
    scale = 1.0 / (HD ** 0.5)

    for l in range(LAYERS):          # unrolled; all layer weights VMEM-resident
        # --- pre-LN multi-head self-attention, batched over B via the mask ---
        xn = _layernorm(x, ln1_g_ref[l], ln1_b_ref[l])
        attn = jnp.zeros((BT, H), f32)
        for h in range(NH):          # per-head WEIGHT slices (no activation slicing)
            qh = jnp.dot(xn, wq_ref[l, h], preferred_element_type=f32) + bq_ref[l, h]
            kh = jnp.dot(xn, wk_ref[l, h], preferred_element_type=f32) + bk_ref[l, h]
            vh = jnp.dot(xn, wv_ref[l, h], preferred_element_type=f32) + bv_ref[l, h]
            s = jax.lax.dot_general(qh, kh, (((1,), (1,)), ((), ())),
                                    preferred_element_type=f32) * scale + mask
            s = s - jnp.max(s, axis=-1, keepdims=True)
            p = jnp.exp(s)
            p = p * pl.reciprocal(jnp.sum(p, axis=-1, keepdims=True), approx=True)
            ctx = jnp.dot(p, vh, preferred_element_type=f32)            # (BT, HD)
            attn = attn + jnp.dot(ctx, wo_ref[l, h], preferred_element_type=f32)
        x = x + attn + bo_ref[l]

        # --- pre-LN MLP ---
        xn2 = _layernorm(x, ln2_g_ref[l], ln2_b_ref[l])
        h1 = jnp.dot(xn2, w1_ref[l], preferred_element_type=f32) + bm1_ref[l]
        # TODO(synk): HF/PyTorch ViT default is exact erf-GELU; tanh approx kept (EUP-friendly).
        h1 = jax.nn.gelu(h1, approximate=True)
        x = x + jnp.dot(h1, w2_ref[l], preferred_element_type=f32) + bm2_ref[l]

    # --- final LayerNorm on CLS tokens + merged, lane-padded sigmoid heads ---
    cls_tok = jnp.concatenate([x[b * T:b * T + 1, :] for b in range(B)], axis=0)  # (B, H)
    xn = _layernorm(cls_tok, lnf_g_ref[...], lnf_b_ref[...])
    logits = (jnp.dot(xn, head_w_ref[...], preferred_element_type=f32)
              + head_b_ref[...])                                        # (B, HEAD_PAD)
    out_ref[...] = jax.nn.sigmoid(logits)                               # single dense store


# --------------------------- wrapper -----------------------------------------
def _full_spec(a):
    nd = a.ndim
    return pl.BlockSpec(a.shape, lambda i, _nd=nd: (0,) * _nd)


def multi_head_vit_forward(x, params):
    # x: (B, C, IMG, IMG), NCHW like the PyTorch module.
    # im2col for the patch-embed conv (kernel = stride = P), (channel, ph, pw) order.
    patches = (x.reshape(B, C, GRIDP, P, GRIDP, P)
                 .transpose(0, 2, 4, 1, 3, 5)
                 .reshape(B * N, CPP))
    args = (patches,
            params["patch_w"], params["patch_b"], params["cls_pos"],
            params["attn_mask"],
            params["ln1_g"], params["ln1_b"],
            params["wq"], params["wk"], params["wv"],
            params["bq"], params["bk"], params["bv"],
            params["wo"], params["bo"],
            params["ln2_g"], params["ln2_b"],
            params["w1"], params["bm1"], params["w2"], params["bm2"],
            params["lnf_g"], params["lnf_b"],
            params["head_w"], params["head_b"])
    out = pl.pallas_call(
        _vit_fused_kernel,
        out_shape=jax.ShapeDtypeStruct((B, HEAD_PAD), jnp.float32),
        grid=(1,),
        in_specs=[_full_spec(a) for a in args],
        out_specs=pl.BlockSpec((B, HEAD_PAD), lambda i: (0, 0)),
        compiler_params=pltpu.CompilerParams(
            dimension_semantics=("arbitrary",)),
    )(*args)
    reg_out = out[:, :3]            # (B, 3)
    bin_out = out[:, 3]             # (B,)
    return reg_out, bin_out


# --------------------------- parameter init ----------------------------------
def init_params(key):
    ks = iter(jax.random.split(key, 16))
    nrm = lambda shape, s=0.02: (s * jax.random.normal(next(ks), shape)
                                 ).astype(jnp.float32)

    # CLS + positional embedding pre-fused into one (T, H) table:
    # row 0 = cls + pos[0], rows 1..N = pos[1..N]
    cls = nrm((1, H))
    pos = nrm((T, H))
    cls_pos = pos.at[0].add(cls[0])

    # merged reg(3)/bin(1) head, lane-padded to 128 for a dense output store
    reg_w, bin_w = nrm((H, 3)), nrm((H, 1))
    head_w = (jnp.zeros((H, HEAD_PAD), jnp.float32)
              .at[:, 0:3].set(reg_w).at[:, 3:4].set(bin_w))
    head_b = jnp.zeros((1, HEAD_PAD), jnp.float32)

    # stacked encoder-layer weights, QKV/out-proj pre-split per head
    wqkv = nrm((LAYERS, H, 3 * H))

    def split_heads_cols(w):        # (L, H, H) -> (L, NH, H, HD)
        return w.reshape(LAYERS, H, NH, HD).transpose(0, 2, 1, 3)

    wq = split_heads_cols(wqkv[:, :, 0 * H:1 * H])
    wk = split_heads_cols(wqkv[:, :, 1 * H:2 * H])
    wv = split_heads_cols(wqkv[:, :, 2 * H:3 * H])
    wo = nrm((LAYERS, H, H)).reshape(LAYERS, NH, HD, H)   # row blocks per head

    # block-diagonal additive attention mask over the batch-folded rows
    row_b = jnp.arange(BT)[:, None] // T
    col_b = jnp.arange(BT)[None, :] // T
    attn_mask = jnp.where(row_b == col_b, 0.0, -1e30).astype(jnp.float32)

    return {
        "patch_w": nrm((CPP, H)),
        "patch_b": jnp.zeros((1, H), jnp.float32),
        "cls_pos": cls_pos,
        "attn_mask": attn_mask,
        "ln1_g": jnp.ones((LAYERS, 1, H), jnp.float32),
        "ln1_b": jnp.zeros((LAYERS, 1, H), jnp.float32),
        "wq": wq, "wk": wk, "wv": wv,
        "bq": jnp.zeros((LAYERS, NH, 1, HD), jnp.float32),
        "bk": jnp.zeros((LAYERS, NH, 1, HD), jnp.float32),
        "bv": jnp.zeros((LAYERS, NH, 1, HD), jnp.float32),
        "wo": wo,
        "bo": jnp.zeros((LAYERS, 1, H), jnp.float32),
        "ln2_g": jnp.ones((LAYERS, 1, H), jnp.float32),
        "ln2_b": jnp.zeros((LAYERS, 1, H), jnp.float32),
        "w1": nrm((LAYERS, H, MLP)),
        "bm1": jnp.zeros((LAYERS, 1, MLP), jnp.float32),
        "w2": nrm((LAYERS, MLP, H)),
        "bm2": jnp.zeros((LAYERS, 1, H), jnp.float32),
        "lnf_g": jnp.ones((1, H), jnp.float32),
        "lnf_b": jnp.zeros((1, H), jnp.float32),
        "head_w": head_w,
        "head_b": head_b,
    }


# ------------------------------- main -----------------------------------------
if __name__ == "__main__":
    key = jax.random.PRNGKey(0)
    k_x, k_p = jax.random.split(key)
    x = jax.random.normal(k_x, (B, C, IMG, IMG), dtype=jnp.float32)
    params = init_params(k_p)

    fwd = jax.jit(multi_head_vit_forward)
    reg_out, bin_out = fwd(x, params)
    jax.block_until_ready((reg_out, bin_out))

    assert reg_out.shape == (B, 3) and bin_out.shape == (B,)
    assert bool(jnp.all(jnp.isfinite(reg_out))) and bool(jnp.all(jnp.isfinite(bin_out)))
    assert bool(jnp.all((reg_out >= 0) & (reg_out <= 1)))
    assert bool(jnp.all((bin_out >= 0) & (bin_out <= 1)))
    print("KERNEL_OK")
</pallas_src>

<mosaic_0001>
module attributes {stable_mosaic.version = 11 : i64} {
  func.func @_vit_fused_kernel(%arg0: i32, %arg1: memref<8x192xf32, #tpu.memory_space<vmem>>, %arg2: memref<192x32xf32, #tpu.memory_space<vmem>>, %arg3: memref<1x32xf32, #tpu.memory_space<vmem>>, %arg4: memref<5x32xf32, #tpu.memory_space<vmem>>, %arg5: memref<10x10xf32, #tpu.memory_space<vmem>>, %arg6: memref<2x1x32xf32, #tpu.memory_space<vmem>>, %arg7: memref<2x1x32xf32, #tpu.memory_space<vmem>>, %arg8: memref<2x2x32x16xf32, #tpu.memory_space<vmem>>, %arg9: memref<2x2x32x16xf32, #tpu.memory_space<vmem>>, %arg10: memref<2x2x32x16xf32, #tpu.memory_space<vmem>>, %arg11: memref<2x2x1x16xf32, #tpu.memory_space<vmem>>, %arg12: memref<2x2x1x16xf32, #tpu.memory_space<vmem>>, %arg13: memref<2x2x1x16xf32, #tpu.memory_space<vmem>>, %arg14: memref<2x2x16x32xf32, #tpu.memory_space<vmem>>, %arg15: memref<2x1x32xf32, #tpu.memory_space<vmem>>, %arg16: memref<2x1x32xf32, #tpu.memory_space<vmem>>, %arg17: memref<2x1x32xf32, #tpu.memory_space<vmem>>, %arg18: memref<2x32x64xf32, #tpu.memory_space<vmem>>, %arg19: memref<2x1x64xf32, #tpu.memory_space<vmem>>, %arg20: memref<2x64x32xf32, #tpu.memory_space<vmem>>, %arg21: memref<2x1x32xf32, #tpu.memory_space<vmem>>, %arg22: memref<1x32xf32, #tpu.memory_space<vmem>>, %arg23: memref<1x32xf32, #tpu.memory_space<vmem>>, %arg24: memref<32x128xf32, #tpu.memory_space<vmem>>, %arg25: memref<1x128xf32, #tpu.memory_space<vmem>>, %arg26: memref<2x128xf32, #tpu.memory_space<vmem>>) attributes {dimension_semantics = [#tpu.dimension_semantics<arbitrary>], iteration_bounds = array<i64: 1>, scalar_prefetch = 0 : i64, scratch_operands = 0 : i64, tpu.core_type = #tpu.core_type<tc>, window_params = [{pipeline_mode = #tpu.pipeline_mode<synchronous>, transform_indices = @transform_0, window_bounds = array<i64: 8, 192>}, {pipeline_mode = #tpu.pipeline_mode<synchronous>, transform_indices = @transform_1, window_bounds = array<i64: 192, 32>}, {pipeline_mode = #tpu.pipeline_mode<synchronous>, transform_indices = @transform_2, window_bounds = array<i64: 1, 32>}, {pipeline_mode = #tpu.pipeline_mode<synchronous>, transform_indices = @transform_3, window_bounds = array<i64: 5, 32>}, {pipeline_mode = #tpu.pipeline_mode<synchronous>, transform_indices = @transform_4, window_bounds = array<i64: 10, 10>}, {pipeline_mode = #tpu.pipeline_mode<synchronous>, transform_indices = @transform_5, window_bounds = array<i64: 2, 1, 32>}, {pipeline_mode = #tpu.pipeline_mode<synchronous>, transform_indices = @transform_6, window_bounds = array<i64: 2, 1, 32>}, {pipeline_mode = #tpu.pipeline_mode<synchronous>, transform_indices = @transform_7, window_bounds = array<i64: 2, 2, 32, 16>}, {pipeline_mode = #tpu.pipeline_mode<synchronous>, transform_indices = @transform_8, window_bounds = array<i64: 2, 2, 32, 16>}, {pipeline_mode = #tpu.pipeline_mode<synchronous>, transform_indices = @transform_9, window_bounds = array<i64: 2, 2, 32, 16>}, {pipeline_mode = #tpu.pipeline_mode<synchronous>, transform_indices = @transform_10, window_bounds = array<i64: 2, 2, 1, 16>}, {pipeline_mode = #tpu.pipeline_mode<synchronous>, transform_indices = @transform_11, window_bounds = array<i64: 2, 2, 1, 16>}, {pipeline_mode = #tpu.pipeline_mode<synchronous>, transform_indices = @transform_12, window_bounds = array<i64: 2, 2, 1, 16>}, {pipeline_mode = #tpu.pipeline_mode<synchronous>, transform_indices = @transform_13, window_bounds = array<i64: 2, 2, 16, 32>}, {pipeline_mode = #tpu.pipeline_mode<synchronous>, transform_indices = @transform_14, window_bounds = array<i64: 2, 1, 32>}, {pipeline_mode = #tpu.pipeline_mode<synchronous>, transform_indices = @transform_15, window_bounds = array<i64: 2, 1, 32>}, {pipeline_mode = #tpu.pipeline_mode<synchronous>, transform_indices = @transform_16, window_bounds = array<i64: 2, 1, 32>}, {pipeline_mode = #tpu.pipeline_mode<synchronous>, transform_indices = @transform_17, window_bounds = array<i64: 2, 32, 64>}, {pipeline_mode = #tpu.pipeline_mode<synchronous>, transform_indices = @transform_18, window_bounds = array<i64: 2, 1, 64>}, {pipeline_mode = #tpu.pipeline_mode<synchronous>, transform_indices = @transform_19, window_bounds = array<i64: 2, 64, 32>}, {pipeline_mode = #tpu.pipeline_mode<synchronous>, transform_indices = @transform_20, window_bounds = array<i64: 2, 1, 32>}, {pipeline_mode = #tpu.pipeline_mode<synchronous>, transform_indices = @transform_21, window_bounds = array<i64: 1, 32>}, {pipeline_mode = #tpu.pipeline_mode<synchronous>, transform_indices = @transform_22, window_bounds = array<i64: 1, 32>}, {pipeline_mode = #tpu.pipeline_mode<synchronous>, transform_indices = @transform_23, window_bounds = array<i64: 32, 128>}, {pipeline_mode = #tpu.pipeline_mode<synchronous>, transform_indices = @transform_24, window_bounds = array<i64: 1, 128>}, {pipeline_mode = #tpu.pipeline_mode<synchronous>, transform_indices = @transform_25, window_bounds = array<i64: 2, 128>}]} {
    %c0 = arith.constant 0 : index
    %c0_0 = arith.constant 0 : index
    %0 = vector.load %arg1[%c0, %c0_0] : memref<8x192xf32, #tpu.memory_space<vmem>>, vector<8x192xf32>
    %c0_1 = arith.constant 0 : index
    %c0_2 = arith.constant 0 : index
    %1 = vector.load %arg2[%c0_1, %c0_2] : memref<192x32xf32, #tpu.memory_space<vmem>>, vector<192x32xf32>
    %cst = arith.constant dense<0.000000e+00> : vector<8x32xf32>
    %2 = tpu.matmul %0, %1, %cst {dimension_numbers = #tpu.dot_dimension_numbers<[1], [0], [0], [1], [0, 0, 1, 1], [], []>} : vector<8x192xf32>, vector<192x32xf32>, vector<8x32xf32> -> vector<8x32xf32>
    %c0_3 = arith.constant 0 : index
    %c0_4 = arith.constant 0 : index
    %3 = vector.load %arg3[%c0_3, %c0_4] : memref<1x32xf32, #tpu.memory_space<vmem>>, vector<1x32xf32>
    %4 = vector.broadcast %3 : vector<1x32xf32> to vector<8x32xf32>
    %5 = arith.addf %2, %4 : vector<8x32xf32>
    %c0_5 = arith.constant 0 : index
    %c0_6 = arith.constant 0 : index
    %6 = vector.load %arg4[%c0_5, %c0_6] : memref<5x32xf32, #tpu.memory_space<vmem>>, vector<5x32xf32>
    %7 = vector.extract_strided_slice %6 {offsets = [0, 0], sizes = [1, 32], strides = [1, 1]} : vector<5x32xf32> to vector<1x32xf32>
    %8 = vector.extract_strided_slice %5 {offsets = [0, 0], sizes = [4, 32], strides = [1, 1]} : vector<8x32xf32> to vector<4x32xf32>
    %9 = vector.extract_strided_slice %6 {offsets = [1, 0], sizes = [4, 32], strides = [1, 1]} : vector<5x32xf32> to vector<4x32xf32>
    %10 = arith.addf %8, %9 : vector<4x32xf32>
    %11 = vector.extract_strided_slice %6 {offsets = [0, 0], sizes = [1, 32], strides = [1, 1]} : vector<5x32xf32> to vector<1x32xf32>
    %12 = vector.extract_strided_slice %5 {offsets = [4, 0], sizes = [4, 32], strides = [1, 1]} : vector<8x32xf32> to vector<4x32xf32>
    %13 = vector.extract_strided_slice %6 {offsets = [1, 0], sizes = [4, 32], strides = [1, 1]} : vector<5x32xf32> to vector<4x32xf32>
    %14 = arith.addf %12, %13 : vector<4x32xf32>
    %15 = tpu.concatenate %7, %10, %11, %14 in 0 : vector<1x32xf32>, vector<4x32xf32>, vector<1x32xf32>, vector<4x32xf32> -> vector<10x32xf32>
    %c0_7 = arith.constant 0 : index
    %c0_8 = arith.constant 0 : index
    %16 = vector.load %arg5[%c0_7, %c0_8] : memref<10x10xf32, #tpu.memory_space<vmem>>, vector<10x10xf32>
    %c0_9 = arith.constant 0 : index
    %c0_10 = arith.constant 0 : index
    %c0_11 = arith.constant 0 : index
    %17 = vector.load %arg6[%c0_9, %c0_10, %c0_11] : memref<2x1x32xf32, #tpu.memory_space<vmem>>, vector<1x1x32xf32>
    %18 = vector.shape_cast %17 : vector<1x1x32xf32> to vector<1x32xf32>
    %c0_12 = arith.constant 0 : index
    %c0_13 = arith.constant 0 : index
    %c0_14 = arith.constant 0 : index
    %19 = vector.load %arg7[%c0_12, %c0_13, %c0_14] : memref<2x1x32xf32, #tpu.memory_space<vmem>>, vector<1x1x32xf32>
    %20 = vector.shape_cast %19 : vector<1x1x32xf32> to vector<1x32xf32>
    %cst_15 = arith.constant dense<0.000000e+00> : vector<10xf32>
    %21 = vector.multi_reduction <add>, %15, %cst_15 [1] : vector<10x32xf32> to vector<10xf32>
    %22 = vector.shape_cast %21 : vector<10xf32> to vector<10x1xf32>
    %cst_16 = arith.constant 3.200000e+01 : f32
    %23 = vector.broadcast %cst_16 : f32 to vector<10x1xf32>
    %24 = arith.divf %22, %23 : vector<10x1xf32>
    %25 = vector.broadcast %24 : vector<10x1xf32> to vector<10x32xf32>
    %26 = arith.subf %15, %25 : vector<10x32xf32>
    %27 = arith.mulf %26, %26 : vector<10x32xf32>
    %cst_17 = arith.constant dense<0.000000e+00> : vector<10xf32>
    %28 = vector.multi_reduction <add>, %27, %cst_17 [1] : vector<10x32xf32> to vector<10xf32>
    %29 = vector.shape_cast %28 : vector<10xf32> to vector<10x1xf32>
    %cst_18 = arith.constant 3.200000e+01 : f32
    %30 = vector.broadcast %cst_18 : f32 to vector<10x1xf32>
    %31 = arith.divf %29, %30 : vector<10x1xf32>
    %32 = vector.broadcast %24 : vector<10x1xf32> to vector<10x32xf32>
    %33 = arith.subf %15, %32 : vector<10x32xf32>
    %cst_19 = arith.constant 9.99999997E-7 : f32
    %34 = vector.broadcast %cst_19 : f32 to vector<10x1xf32>
    %35 = arith.addf %31, %34 : vector<10x1xf32>
    %36 = math.rsqrt %35 : vector<10x1xf32>
    %37 = vector.broadcast %36 : vector<10x1xf32> to vector<10x32xf32>
    %38 = arith.mulf %33, %37 : vector<10x32xf32>
    %39 = vector.broadcast %18 : vector<1x32xf32> to vector<10x32xf32>
    %40 = arith.mulf %38, %39 : vector<10x32xf32>
    %41 = vector.broadcast %20 : vector<1x32xf32> to vector<10x32xf32>
    %42 = arith.addf %40, %41 : vector<10x32xf32>
    %cst_20 = arith.constant 0.000000e+00 : f32
    %43 = vector.broadcast %cst_20 : f32 to vector<10x32xf32>
    %c0_21 = arith.constant 0 : index
    %c0_22 = arith.constant 0 : index
    %c0_23 = arith.constant 0 : index
    %c0_24 = arith.constant 0 : index
    %44 = vector.load %arg8[%c0_21, %c0_22, %c0_23, %c0_24] : memref<2x2x32x16xf32, #tpu.memory_space<vmem>>, vector<1x1x32x16xf32>
    %45 = vector.shape_cast %44 : vector<1x1x32x16xf32> to vector<32x16xf32>
    %cst_25 = arith.constant dense<0.000000e+00> : vector<10x16xf32>
    %46 = tpu.matmul %42, %45, %cst_25 {dimension_numbers = #tpu.dot_dimension_numbers<[1], [0], [0], [1], [0, 0, 1, 1], [], []>} : vector<10x32xf32>, vector<32x16xf32>, vector<10x16xf32> -> vector<10x16xf32>
    %c0_26 = arith.constant 0 : index
    %c0_27 = arith.constant 0 : index
    %c0_28 = arith.constant 0 : index
    %c0_29 = arith.constant 0 : index
    %47 = vector.load %arg11[%c0_26, %c0_27, %c0_28, %c0_29] : memref<2x2x1x16xf32, #tpu.memory_space<vmem>>, vector<1x1x1x16xf32>
    %48 = vector.shape_cast %47 : vector<1x1x1x16xf32> to vector<1x16xf32>
    %49 = vector.broadcast %48 : vector<1x16xf32> to vector<10x16xf32>
    %50 = arith.addf %46, %49 : vector<10x16xf32>
    %c0_30 = arith.constant 0 : index
    %c0_31 = arith.constant 0 : index
    %c0_32 = arith.constant 0 : index
    %c0_33 = arith.constant 0 : index
    %51 = vector.load %arg9[%c0_30, %c0_31, %c0_32, %c0_33] : memref<2x2x32x16xf32, #tpu.memory_space<vmem>>, vector<1x1x32x16xf32>
    %52 = vector.shape_cast %51 : vector<1x1x32x16xf32> to vector<32x16xf32>
    %cst_34 = arith.constant dense<0.000000e+00> : vector<10x16xf32>
    %53 = tpu.matmul %42, %52, %cst_34 {dimension_numbers = #tpu.dot_dimension_numbers<[1], [0], [0], [1], [0, 0, 1, 1], [], []>} : vector<10x32xf32>, vector<32x16xf32>, vector<10x16xf32> -> vector<10x16xf32>
    %c0_35 = arith.constant 0 : index
    %c0_36 = arith.constant 0 : index
    %c0_37 = arith.constant 0 : index
    %c0_38 = arith.constant 0 : index
    %54 = vector.load %arg12[%c0_35, %c0_36, %c0_37, %c0_38] : memref<2x2x1x16xf32, #tpu.memory_space<vmem>>, vector<1x1x1x16xf32>
    %55 = vector.shape_cast %54 : vector<1x1x1x16xf32> to vector<1x16xf32>
    %56 = vector.broadcast %55 : vector<1x16xf32> to vector<10x16xf32>
    %57 = arith.addf %53, %56 : vector<10x16xf32>
    %c0_39 = arith.constant 0 : index
    %c0_40 = arith.constant 0 : index
    %c0_41 = arith.constant 0 : index
    %c0_42 = arith.constant 0 : index
    %58 = vector.load %arg10[%c0_39, %c0_40, %c0_41, %c0_42] : memref<2x2x32x16xf32, #tpu.memory_space<vmem>>, vector<1x1x32x16xf32>
    %59 = vector.shape_cast %58 : vector<1x1x32x16xf32> to vector<32x16xf32>
    %cst_43 = arith.constant dense<0.000000e+00> : vector<10x16xf32>
    %60 = tpu.matmul %42, %59, %cst_43 {dimension_numbers = #tpu.dot_dimension_numbers<[1], [0], [0], [1], [0, 0, 1, 1], [], []>} : vector<10x32xf32>, vector<32x16xf32>, vector<10x16xf32> -> vector<10x16xf32>
    %c0_44 = arith.constant 0 : index
    %c0_45 = arith.constant 0 : index
    %c0_46 = arith.constant 0 : index
    %c0_47 = arith.constant 0 : index
    %61 = vector.load %arg13[%c0_44, %c0_45, %c0_46, %c0_47] : memref<2x2x1x16xf32, #tpu.memory_space<vmem>>, vector<1x1x1x16xf32>
    %62 = vector.shape_cast %61 : vector<1x1x1x16xf32> to vector<1x16xf32>
    %63 = vector.broadcast %62 : vector<1x16xf32> to vector<10x16xf32>
    %64 = arith.addf %60, %63 : vector<10x16xf32>
    %cst_48 = arith.constant dense<0.000000e+00> : vector<10x10xf32>
    %65 = tpu.matmul %50, %57, %cst_48 {dimension_numbers = #tpu.dot_dimension_numbers<[1], [1], [0], [0], [0, 0, 1, 0], [], []>} : vector<10x16xf32>, vector<10x16xf32>, vector<10x10xf32> -> vector<10x10xf32>
    %cst_49 = arith.constant 2.500000e-01 : f32
    %66 = vector.broadcast %cst_49 : f32 to vector<10x10xf32>
    %67 = arith.mulf %65, %66 : vector<10x10xf32>
    %68 = arith.addf %67, %16 : vector<10x10xf32>
    %cst_50 = arith.constant dense<0xFF800000> : vector<10xf32>
    %69 = vector.multi_reduction <maximumf>, %68, %cst_50 [1] : vector<10x10xf32> to vector<10xf32>
    %70 = vector.shape_cast %69 : vector<10xf32> to vector<10x1xf32>
    %71 = vector.broadcast %70 : vector<10x1xf32> to vector<10x10xf32>
    %72 = arith.subf %68, %71 : vector<10x10xf32>
    %73 = math.exp %72 : vector<10x10xf32>
    %cst_51 = arith.constant dense<0.000000e+00> : vector<10xf32>
    %74 = vector.multi_reduction <add>, %73, %cst_51 [1] : vector<10x10xf32> to vector<10xf32>
    %75 = vector.shape_cast %74 : vector<10xf32> to vector<10x1xf32>
    %76 = tpu.reciprocal %75 {approx = true} : vector<10x1xf32> -> vector<10x1xf32>
    %77 = vector.broadcast %76 : vector<10x1xf32> to vector<10x10xf32>
    %78 = arith.mulf %73, %77 : vector<10x10xf32>
    %cst_52 = arith.constant dense<0.000000e+00> : vector<10x16xf32>
    %79 = tpu.matmul %78, %64, %cst_52 {dimension_numbers = #tpu.dot_dimension_numbers<[1], [0], [0], [1], [0, 0, 1, 1], [], []>} : vector<10x10xf32>, vector<10x16xf32>, vector<10x16xf32> -> vector<10x16xf32>
    %c0_53 = arith.constant 0 : index
    %c0_54 = arith.constant 0 : index
    %c0_55 = arith.constant 0 : index
    %c0_56 = arith.constant 0 : index
    %80 = vector.load %arg14[%c0_53, %c0_54, %c0_55, %c0_56] : memref<2x2x16x32xf32, #tpu.memory_space<vmem>>, vector<1x1x16x32xf32>
    %81 = vector.shape_cast %80 : vector<1x1x16x32xf32> to vector<16x32xf32>
    %cst_57 = arith.constant dense<0.000000e+00> : vector<10x32xf32>
    %82 = tpu.matmul %79, %81, %cst_57 {dimension_numbers = #tpu.dot_dimension_numbers<[1], [0], [0], [1], [0, 0, 1, 1], [], []>} : vector<10x16xf32>, vector<16x32xf32>, vector<10x32xf32> -> vector<10x32xf32>
    %83 = arith.addf %43, %82 : vector<10x32xf32>
    %c0_58 = arith.constant 0 : index
    %c1 = arith.constant 1 : index
    %c0_59 = arith.constant 0 : index
    %c0_60 = arith.constant 0 : index
    %84 = vector.load %arg8[%c0_58, %c1, %c0_59, %c0_60] : memref<2x2x32x16xf32, #tpu.memory_space<vmem>>, vector<1x1x32x16xf32>
    %85 = vector.shape_cast %84 : vector<1x1x32x16xf32> to vector<32x16xf32>
    %cst_61 = arith.constant dense<0.000000e+00> : vector<10x16xf32>
    %86 = tpu.matmul %42, %85, %cst_61 {dimension_numbers = #tpu.dot_dimension_numbers<[1], [0], [0], [1], [0, 0, 1, 1], [], []>} : vector<10x32xf32>, vector<32x16xf32>, vector<10x16xf32> -> vector<10x16xf32>
    %c0_62 = arith.constant 0 : index
    %c1_63 = arith.constant 1 : index
    %c0_64 = arith.constant 0 : index
    %c0_65 = arith.constant 0 : index
    %87 = vector.load %arg11[%c0_62, %c1_63, %c0_64, %c0_65] : memref<2x2x1x16xf32, #tpu.memory_space<vmem>>, vector<1x1x1x16xf32>
    %88 = vector.shape_cast %87 : vector<1x1x1x16xf32> to vector<1x16xf32>
    %89 = vector.broadcast %88 : vector<1x16xf32> to vector<10x16xf32>
    %90 = arith.addf %86, %89 : vector<10x16xf32>
    %c0_66 = arith.constant 0 : index
    %c1_67 = arith.constant 1 : index
    %c0_68 = arith.constant 0 : index
    %c0_69 = arith.constant 0 : index
    %91 = vector.load %arg9[%c0_66, %c1_67, %c0_68, %c0_69] : memref<2x2x32x16xf32, #tpu.memory_space<vmem>>, vector<1x1x32x16xf32>
    %92 = vector.shape_cast %91 : vector<1x1x32x16xf32> to vector<32x16xf32>
    %cst_70 = arith.constant dense<0.000000e+00> : vector<10x16xf32>
    %93 = tpu.matmul %42, %92, %cst_70 {dimension_numbers = #tpu.dot_dimension_numbers<[1], [0], [0], [1], [0, 0, 1, 1], [], []>} : vector<10x32xf32>, vector<32x16xf32>, vector<10x16xf32> -> vector<10x16xf32>
    %c0_71 = arith.constant 0 : index
    %c1_72 = arith.constant 1 : index
    %c0_73 = arith.constant 0 : index
    %c0_74 = arith.constant 0 : index
    %94 = vector.load %arg12[%c0_71, %c1_72, %c0_73, %c0_74] : memref<2x2x1x16xf32, #tpu.memory_space<vmem>>, vector<1x1x1x16xf32>
    %95 = vector.shape_cast %94 : vector<1x1x1x16xf32> to vector<1x16xf32>
    %96 = vector.broadcast %95 : vector<1x16xf32> to vector<10x16xf32>
    %97 = arith.addf %93, %96 : vector<10x16xf32>
    %c0_75 = arith.constant 0 : index
    %c1_76 = arith.constant 1 : index
    %c0_77 = arith.constant 0 : index
    %c0_78 = arith.constant 0 : index
    %98 = vector.load %arg10[%c0_75, %c1_76, %c0_77, %c0_78] : memref<2x2x32x16xf32, #tpu.memory_space<vmem>>, vector<1x1x32x16xf32>
    %99 = vector.shape_cast %98 : vector<1x1x32x16xf32> to vector<32x16xf32>
    %cst_79 = arith.constant dense<0.000000e+00> : vector<10x16xf32>
    %100 = tpu.matmul %42, %99, %cst_79 {dimension_numbers = #tpu.dot_dimension_numbers<[1], [0], [0], [1], [0, 0, 1, 1], [], []>} : vector<10x32xf32>, vector<32x16xf32>, vector<10x16xf32> -> vector<10x16xf32>
    %c0_80 = arith.constant 0 : index
    %c1_81 = arith.constant 1 : index
    %c0_82 = arith.constant 0 : index
    %c0_83 = arith.constant 0 : index
    %101 = vector.load %arg13[%c0_80, %c1_81, %c0_82, %c0_83] : memref<2x2x1x16xf32, #tpu.memory_space<vmem>>, vector<1x1x1x16xf32>
    %102 = vector.shape_cast %101 : vector<1x1x1x16xf32> to vector<1x16xf32>
    %103 = vector.broadcast %102 : vector<1x16xf32> to vector<10x16xf32>
    %104 = arith.addf %100, %103 : vector<10x16xf32>
    %cst_84 = arith.constant dense<0.000000e+00> : vector<10x10xf32>
    %105 = tpu.matmul %90, %97, %cst_84 {dimension_numbers = #tpu.dot_dimension_numbers<[1], [1], [0], [0], [0, 0, 1, 0], [], []>} : vector<10x16xf32>, vector<10x16xf32>, vector<10x10xf32> -> vector<10x10xf32>
    %cst_85 = arith.constant 2.500000e-01 : f32
    %106 = vector.broadcast %cst_85 : f32 to vector<10x10xf32>
    %107 = arith.mulf %105, %106 : vector<10x10xf32>
    %108 = arith.addf %107, %16 : vector<10x10xf32>
    %cst_86 = arith.constant dense<0xFF800000> : vector<10xf32>
    %109 = vector.multi_reduction <maximumf>, %108, %cst_86 [1] : vector<10x10xf32> to vector<10xf32>
    %110 = vector.shape_cast %109 : vector<10xf32> to vector<10x1xf32>
    %111 = vector.broadcast %110 : vector<10x1xf32> to vector<10x10xf32>
    %112 = arith.subf %108, %111 : vector<10x10xf32>
    %113 = math.exp %112 : vector<10x10xf32>
    %cst_87 = arith.constant dense<0.000000e+00> : vector<10xf32>
    %114 = vector.multi_reduction <add>, %113, %cst_87 [1] : vector<10x10xf32> to vector<10xf32>
    %115 = vector.shape_cast %114 : vector<10xf32> to vector<10x1xf32>
    %116 = tpu.reciprocal %115 {approx = true} : vector<10x1xf32> -> vector<10x1xf32>
    %117 = vector.broadcast %116 : vector<10x1xf32> to vector<10x10xf32>
    %118 = arith.mulf %113, %117 : vector<10x10xf32>
    %cst_88 = arith.constant dense<0.000000e+00> : vector<10x16xf32>
    %119 = tpu.matmul %118, %104, %cst_88 {dimension_numbers = #tpu.dot_dimension_numbers<[1], [0], [0], [1], [0, 0, 1, 1], [], []>} : vector<10x10xf32>, vector<10x16xf32>, vector<10x16xf32> -> vector<10x16xf32>
    %c0_89 = arith.constant 0 : index
    %c1_90 = arith.constant 1 : index
    %c0_91 = arith.constant 0 : index
    %c0_92 = arith.constant 0 : index
    %120 = vector.load %arg14[%c0_89, %c1_90, %c0_91, %c0_92] : memref<2x2x16x32xf32, #tpu.memory_space<vmem>>, vector<1x1x16x32xf32>
    %121 = vector.shape_cast %120 : vector<1x1x16x32xf32> to vector<16x32xf32>
    %cst_93 = arith.constant dense<0.000000e+00> : vector<10x32xf32>
    %122 = tpu.matmul %119, %121, %cst_93 {dimension_numbers = #tpu.dot_dimension_numbers<[1], [0], [0], [1], [0, 0, 1, 1], [], []>} : vector<10x16xf32>, vector<16x32xf32>, vector<10x32xf32> -> vector<10x32xf32>
    %123 = arith.addf %83, %122 : vector<10x32xf32>
    %124 = arith.addf %15, %123 : vector<10x32xf32>
    %c0_94 = arith.constant 0 : index
    %c0_95 = arith.constant 0 : index
    %c0_96 = arith.constant 0 : index
    %125 = vector.load %arg15[%c0_94, %c0_95, %c0_96] : memref<2x1x32xf32, #tpu.memory_space<vmem>>, vector<1x1x32xf32>
    %126 = vector.shape_cast %125 : vector<1x1x32xf32> to vector<1x32xf32>
    %127 = vector.broadcast %126 : vector<1x32xf32> to vector<10x32xf32>
    %128 = arith.addf %124, %127 : vector<10x32xf32>
    %c0_97 = arith.constant 0 : index
    %c0_98 = arith.constant 0 : index
    %c0_99 = arith.constant 0 : index
    %129 = vector.load %arg16[%c0_97, %c0_98, %c0_99] : memref<2x1x32xf32, #tpu.memory_space<vmem>>, vector<1x1x32xf32>
    %130 = vector.shape_cast %129 : vector<1x1x32xf32> to vector<1x32xf32>
    %c0_100 = arith.constant 0 : index
    %c0_101 = arith.constant 0 : index
    %c0_102 = arith.constant 0 : index
    %131 = vector.load %arg17[%c0_100, %c0_101, %c0_102] : memref<2x1x32xf32, #tpu.memory_space<vmem>>, vector<1x1x32xf32>
    %132 = vector.shape_cast %131 : vector<1x1x32xf32> to vector<1x32xf32>
    %cst_103 = arith.constant dense<0.000000e+00> : vector<10xf32>
    %133 = vector.multi_reduction <add>, %128, %cst_103 [1] : vector<10x32xf32> to vector<10xf32>
    %134 = vector.shape_cast %133 : vector<10xf32> to vector<10x1xf32>
    %cst_104 = arith.constant 3.200000e+01 : f32
    %135 = vector.broadcast %cst_104 : f32 to vector<10x1xf32>
    %136 = arith.divf %134, %135 : vector<10x1xf32>
    %137 = vector.broadcast %136 : vector<10x1xf32> to vector<10x32xf32>
    %138 = arith.subf %128, %137 : vector<10x32xf32>
    %139 = arith.mulf %138, %138 : vector<10x32xf32>
    %cst_105 = arith.constant dense<0.000000e+00> : vector<10xf32>
    %140 = vector.multi_reduction <add>, %139, %cst_105 [1] : vector<10x32xf32> to vector<10xf32>
    %141 = vector.shape_cast %140 : vector<10xf32> to vector<10x1xf32>
    %cst_106 = arith.constant 3.200000e+01 : f32
    %142 = vector.broadcast %cst_106 : f32 to vector<10x1xf32>
    %143 = arith.divf %141, %142 : vector<10x1xf32>
    %144 = vector.broadcast %136 : vector<10x1xf32> to vector<10x32xf32>
    %145 = arith.subf %128, %144 : vector<10x32xf32>
    %cst_107 = arith.constant 9.99999997E-7 : f32
    %146 = vector.broadcast %cst_107 : f32 to vector<10x1xf32>
    %147 = arith.addf %143, %146 : vector<10x1xf32>
    %148 = math.rsqrt %147 : vector<10x1xf32>
    %149 = vector.broadcast %148 : vector<10x1xf32> to vector<10x32xf32>
    %150 = arith.mulf %145, %149 : vector<10x32xf32>
    %151 = vector.broadcast %130 : vector<1x32xf32> to vector<10x32xf32>
    %152 = arith.mulf %150, %151 : vector<10x32xf32>
    %153 = vector.broadcast %132 : vector<1x32xf32> to vector<10x32xf32>
    %154 = arith.addf %152, %153 : vector<10x32xf32>
    %c0_108 = arith.constant 0 : index
    %c0_109 = arith.constant 0 : index
    %c0_110 = arith.constant 0 : index
    %155 = vector.load %arg18[%c0_108, %c0_109, %c0_110] : memref<2x32x64xf32, #tpu.memory_space<vmem>>, vector<1x32x64xf32>
    %156 = vector.shape_cast %155 : vector<1x32x64xf32> to vector<32x64xf32>
    %cst_111 = arith.constant dense<0.000000e+00> : vector<10x64xf32>
    %157 = tpu.matmul %154, %156, %cst_111 {dimension_numbers = #tpu.dot_dimension_numbers<[1], [0], [0], [1], [0, 0, 1, 1], [], []>} : vector<10x32xf32>, vector<32x64xf32>, vector<10x64xf32> -> vector<10x64xf32>
    %c0_112 = arith.constant 0 : index
    %c0_113 = arith.constant 0 : index
    %c0_114 = arith.constant 0 : index
    %158 = vector.load %arg19[%c0_112, %c0_113, %c0_114] : memref<2x1x64xf32, #tpu.memory_space<vmem>>, vector<1x1x64xf32>
    %159 = vector.shape_cast %158 : vector<1x1x64xf32> to vector<1x64xf32>
    %160 = vector.broadcast %159 : vector<1x64xf32> to vector<10x64xf32>
    %161 = arith.addf %157, %160 : vector<10x64xf32>
    %162 = arith.mulf %161, %161 : vector<10x64xf32>
    %163 = arith.mulf %161, %162 : vector<10x64xf32>
    %cst_115 = arith.constant 4.471500e-02 : f32
    %164 = vector.broadcast %cst_115 : f32 to vector<10x64xf32>
    %165 = arith.mulf %164, %163 : vector<10x64xf32>
    %166 = arith.addf %161, %165 : vector<10x64xf32>
    %cst_116 = arith.constant 0.797884583 : f32
    %167 = vector.broadcast %cst_116 : f32 to vector<10x64xf32>
    %168 = arith.mulf %167, %166 : vector<10x64xf32>
    %169 = math.tanh %168 : vector<10x64xf32>
    %cst_117 = arith.constant 1.000000e+00 : f32
    %170 = vector.broadcast %cst_117 : f32 to vector<10x64xf32>
    %171 = arith.addf %170, %169 : vector<10x64xf32>
    %cst_118 = arith.constant 5.000000e-01 : f32
    %172 = vector.broadcast %cst_118 : f32 to vector<10x64xf32>
    %173 = arith.mulf %172, %171 : vector<10x64xf32>
    %174 = arith.mulf %161, %173 : vector<10x64xf32>
    %c0_119 = arith.constant 0 : index
    %c0_120 = arith.constant 0 : index
    %c0_121 = arith.constant 0 : index
    %175 = vector.load %arg20[%c0_119, %c0_120, %c0_121] : memref<2x64x32xf32, #tpu.memory_space<vmem>>, vector<1x64x32xf32>
    %176 = vector.shape_cast %175 : vector<1x64x32xf32> to vector<64x32xf32>
    %cst_122 = arith.constant dense<0.000000e+00> : vector<10x32xf32>
    %177 = tpu.matmul %174, %176, %cst_122 {dimension_numbers = #tpu.dot_dimension_numbers<[1], [0], [0], [1], [0, 0, 1, 1], [], []>} : vector<10x64xf32>, vector<64x32xf32>, vector<10x32xf32> -> vector<10x32xf32>
    %178 = arith.addf %128, %177 : vector<10x32xf32>
    %c0_123 = arith.constant 0 : index
    %c0_124 = arith.constant 0 : index
    %c0_125 = arith.constant 0 : index
    %179 = vector.load %arg21[%c0_123, %c0_124, %c0_125] : memref<2x1x32xf32, #tpu.memory_space<vmem>>, vector<1x1x32xf32>
    %180 = vector.shape_cast %179 : vector<1x1x32xf32> to vector<1x32xf32>
    %181 = vector.broadcast %180 : vector<1x32xf32> to vector<10x32xf32>
    %182 = arith.addf %178, %181 : vector<10x32xf32>
    %c1_126 = arith.constant 1 : index
    %c0_127 = arith.constant 0 : index
    %c0_128 = arith.constant 0 : index
    %183 = vector.load %arg6[%c1_126, %c0_127, %c0_128] : memref<2x1x32xf32, #tpu.memory_space<vmem>>, vector<1x1x32xf32>
    %184 = vector.shape_cast %183 : vector<1x1x32xf32> to vector<1x32xf32>
    %c1_129 = arith.constant 1 : index
    %c0_130 = arith.constant 0 : index
    %c0_131 = arith.constant 0 : index
    %185 = vector.load %arg7[%c1_129, %c0_130, %c0_131] : memref<2x1x32xf32, #tpu.memory_space<vmem>>, vector<1x1x32xf32>
    %186 = vector.shape_cast %185 : vector<1x1x32xf32> to vector<1x32xf32>
    %cst_132 = arith.constant dense<0.000000e+00> : vector<10xf32>
    %187 = vector.multi_reduction <add>, %182, %cst_132 [1] : vector<10x32xf32> to vector<10xf32>
    %188 = vector.shape_cast %187 : vector<10xf32> to vector<10x1xf32>
    %cst_133 = arith.constant 3.200000e+01 : f32
    %189 = vector.broadcast %cst_133 : f32 to vector<10x1xf32>
    %190 = arith.divf %188, %189 : vector<10x1xf32>
    %191 = vector.broadcast %190 : vector<10x1xf32> to vector<10x32xf32>
    %192 = arith.subf %182, %191 : vector<10x32xf32>
    %193 = arith.mulf %192, %192 : vector<10x32xf32>
    %cst_134 = arith.constant dense<0.000000e+00> : vector<10xf32>
    %194 = vector.multi_reduction <add>, %193, %cst_134 [1] : vector<10x32xf32> to vector<10xf32>
    %195 = vector.shape_cast %194 : vector<10xf32> to vector<10x1xf32>
    %cst_135 = arith.constant 3.200000e+01 : f32
    %196 = vector.broadcast %cst_135 : f32 to vector<10x1xf32>
    %197 = arith.divf %195, %196 : vector<10x1xf32>
    %198 = vector.broadcast %190 : vector<10x1xf32> to vector<10x32xf32>
    %199 = arith.subf %182, %198 : vector<10x32xf32>
    %cst_136 = arith.constant 9.99999997E-7 : f32
    %200 = vector.broadcast %cst_136 : f32 to vector<10x1xf32>
    %201 = arith.addf %197, %200 : vector<10x1xf32>
    %202 = math.rsqrt %201 : vector<10x1xf32>
    %203 = vector.broadcast %202 : vector<10x1xf32> to vector<10x32xf32>
    %204 = arith.mulf %199, %203 : vector<10x32xf32>
    %205 = vector.broadcast %184 : vector<1x32xf32> to vector<10x32xf32>
    %206 = arith.mulf %204, %205 : vector<10x32xf32>
    %207 = vector.broadcast %186 : vector<1x32xf32> to vector<10x32xf32>
    %208 = arith.addf %206, %207 : vector<10x32xf32>
    %cst_137 = arith.constant 0.000000e+00 : f32
    %209 = vector.broadcast %cst_137 : f32 to vector<10x32xf32>
    %c1_138 = arith.constant 1 : index
    %c0_139 = arith.constant 0 : index
    %c0_140 = arith.constant 0 : index
    %c0_141 = arith.constant 0 : index
    %210 = vector.load %arg8[%c1_138, %c0_139, %c0_140, %c0_141] : memref<2x2x32x16xf32, #tpu.memory_space<vmem>>, vector<1x1x32x16xf32>
    %211 = vector.shape_cast %210 : vector<1x1x32x16xf32> to vector<32x16xf32>
    %cst_142 = arith.constant dense<0.000000e+00> : vector<10x16xf32>
    %212 = tpu.matmul %208, %211, %cst_142 {dimension_numbers = #tpu.dot_dimension_numbers<[1], [0], [0], [1], [0, 0, 1, 1], [], []>} : vector<10x32xf32>, vector<32x16xf32>, vector<10x16xf32> -> vector<10x16xf32>
    %c1_143 = arith.constant 1 : index
    %c0_144 = arith.constant 0 : index
    %c0_145 = arith.constant 0 : index
    %c0_146 = arith.constant 0 : index
    %213 = vector.load %arg11[%c1_143, %c0_144, %c0_145, %c0_146] : memref<2x2x1x16xf32, #tpu.memory_space<vmem>>, vector<1x1x1x16xf32>
    %214 = vector.shape_cast %213 : vector<1x1x1x16xf32> to vector<1x16xf32>
    %215 = vector.broadcast %214 : vector<1x16xf32> to vector<10x16xf32>
    %216 = arith.addf %212, %215 : vector<10x16xf32>
    %c1_147 = arith.constant 1 : index
    %c0_148 = arith.constant 0 : index
    %c0_149 = arith.constant 0 : index
    %c0_150 = arith.constant 0 : index
    %217 = vector.load %arg9[%c1_147, %c0_148, %c0_149, %c0_150] : memref<2x2x32x16xf32, #tpu.memory_space<vmem>>, vector<1x1x32x16xf32>
    %218 = vector.shape_cast %217 : vector<1x1x32x16xf32> to vector<32x16xf32>
    %cst_151 = arith.constant dense<0.000000e+00> : vector<10x16xf32>
    %219 = tpu.matmul %208, %218, %cst_151 {dimension_numbers = #tpu.dot_dimension_numbers<[1], [0], [0], [1], [0, 0, 1, 1], [], []>} : vector<10x32xf32>, vector<32x16xf32>, vector<10x16xf32> -> vector<10x16xf32>
    %c1_152 = arith.constant 1 : index
    %c0_153 = arith.constant 0 : index
    %c0_154 = arith.constant 0 : index
    %c0_155 = arith.constant 0 : index
    %220 = vector.load %arg12[%c1_152, %c0_153, %c0_154, %c0_155] : memref<2x2x1x16xf32, #tpu.memory_space<vmem>>, vector<1x1x1x16xf32>
    %221 = vector.shape_cast %220 : vector<1x1x1x16xf32> to vector<1x16xf32>
    %222 = vector.broadcast %221 : vector<1x16xf32> to vector<10x16xf32>
    %223 = arith.addf %219, %222 : vector<10x16xf32>
    %c1_156 = arith.constant 1 : index
    %c0_157 = arith.constant 0 : index
    %c0_158 = arith.constant 0 : index
    %c0_159 = arith.constant 0 : index
    %224 = vector.load %arg10[%c1_156, %c0_157, %c0_158, %c0_159] : memref<2x2x32x16xf32, #tpu.memory_space<vmem>>, vector<1x1x32x16xf32>
    %225 = vector.shape_cast %224 : vector<1x1x32x16xf32> to vector<32x16xf32>
    %cst_160 = arith.constant dense<0.000000e+00> : vector<10x16xf32>
    %226 = tpu.matmul %208, %225, %cst_160 {dimension_numbers = #tpu.dot_dimension_numbers<[1], [0], [0], [1], [0, 0, 1, 1], [], []>} : vector<10x32xf32>, vector<32x16xf32>, vector<10x16xf32> -> vector<10x16xf32>
    %c1_161 = arith.constant 1 : index
    %c0_162 = arith.constant 0 : index
    %c0_163 = arith.constant 0 : index
    %c0_164 = arith.constant 0 : index
    %227 = vector.load %arg13[%c1_161, %c0_162, %c0_163, %c0_164] : memref<2x2x1x16xf32, #tpu.memory_space<vmem>>, vector<1x1x1x16xf32>
    %228 = vector.shape_cast %227 : vector<1x1x1x16xf32> to vector<1x16xf32>
    %229 = vector.broadcast %228 : vector<1x16xf32> to vector<10x16xf32>
    %230 = arith.addf %226, %229 : vector<10x16xf32>
    %cst_165 = arith.constant dense<0.000000e+00> : vector<10x10xf32>
    %231 = tpu.matmul %216, %223, %cst_165 {dimension_numbers = #tpu.dot_dimension_numbers<[1], [1], [0], [0], [0, 0, 1, 0], [], []>} : vector<10x16xf32>, vector<10x16xf32>, vector<10x10xf32> -> vector<10x10xf32>
    %cst_166 = arith.constant 2.500000e-01 : f32
    %232 = vector.broadcast %cst_166 : f32 to vector<10x10xf32>
    %233 = arith.mulf %231, %232 : vector<10x10xf32>
    %234 = arith.addf %233, %16 : vector<10x10xf32>
    %cst_167 = arith.constant dense<0xFF800000> : vector<10xf32>
    %235 = vector.multi_reduction <maximumf>, %234, %cst_167 [1] : vector<10x10xf32> to vector<10xf32>
    %236 = vector.shape_cast %235 : vector<10xf32> to vector<10x1xf32>
    %237 = vector.broadcast %236 : vector<10x1xf32> to vector<10x10xf32>
    %238 = arith.subf %234, %237 : vector<10x10xf32>
    %239 = math.exp %238 : vector<10x10xf32>
    %cst_168 = arith.constant dense<0.000000e+00> : vector<10xf32>
    %240 = vector.multi_reduction <add>, %239, %cst_168 [1] : vector<10x10xf32> to vector<10xf32>
    %241 = vector.shape_cast %240 : vector<10xf32> to vector<10x1xf32>
    %242 = tpu.reciprocal %241 {approx = true} : vector<10x1xf32> -> vector<10x1xf32>
    %243 = vector.broadcast %242 : vector<10x1xf32> to vector<10x10xf32>
    %244 = arith.mulf %239, %243 : vector<10x10xf32>
    %cst_169 = arith.constant dense<0.000000e+00> : vector<10x16xf32>
    %245 = tpu.matmul %244, %230, %cst_169 {dimension_numbers = #tpu.dot_dimension_numbers<[1], [0], [0], [1], [0, 0, 1, 1], [], []>} : vector<10x10xf32>, vector<10x16xf32>, vector<10x16xf32> -> vector<10x16xf32>
    %c1_170 = arith.constant 1 : index
    %c0_171 = arith.constant 0 : index
    %c0_172 = arith.constant 0 : index
    %c0_173 = arith.constant 0 : index
    %246 = vector.load %arg14[%c1_170, %c0_171, %c0_172, %c0_173] : memref<2x2x16x32xf32, #tpu.memory_space<vmem>>, vector<1x1x16x32xf32>
    %247 = vector.shape_cast %246 : vector<1x1x16x32xf32> to vector<16x32xf32>
    %cst_174 = arith.constant dense<0.000000e+00> : vector<10x32xf32>
    %248 = tpu.matmul %245, %247, %cst_174 {dimension_numbers = #tpu.dot_dimension_numbers<[1], [0], [0], [1], [0, 0, 1, 1], [], []>} : vector<10x16xf32>, vector<16x32xf32>, vector<10x32xf32> -> vector<10x32xf32>
    %249 = arith.addf %209, %248 : vector<10x32xf32>
    %c1_175 = arith.constant 1 : index
    %c1_176 = arith.constant 1 : index
    %c0_177 = arith.constant 0 : index
    %c0_178 = arith.constant 0 : index
    %250 = vector.load %arg8[%c1_175, %c1_176, %c0_177, %c0_178] : memref<2x2x32x16xf32, #tpu.memory_space<vmem>>, vector<1x1x32x16xf32>
    %251 = vector.shape_cast %250 : vector<1x1x32x16xf32> to vector<32x16xf32>
    %cst_179 = arith.constant dense<0.000000e+00> : vector<10x16xf32>
    %252 = tpu.matmul %208, %251, %cst_179 {dimension_numbers = #tpu.dot_dimension_numbers<[1], [0], [0], [1], [0, 0, 1, 1], [], []>} : vector<10x32xf32>, vector<32x16xf32>, vector<10x16xf32> -> vector<10x16xf32>
    %c1_180 = arith.constant 1 : index
    %c1_181 = arith.constant 1 : index
    %c0_182 = arith.constant 0 : index
    %c0_183 = arith.constant 0 : index
    %253 = vector.load %arg11[%c1_180, %c1_181, %c0_182, %c0_183] : memref<2x2x1x16xf32, #tpu.memory_space<vmem>>, vector<1x1x1x16xf32>
    %254 = vector.shape_cast %253 : vector<1x1x1x16xf32> to vector<1x16xf32>
    %255 = vector.broadcast %254 : vector<1x16xf32> to vector<10x16xf32>
    %256 = arith.addf %252, %255 : vector<10x16xf32>
    %c1_184 = arith.constant 1 : index
    %c1_185 = arith.constant 1 : index
    %c0_186 = arith.constant 0 : index
    %c0_187 = arith.constant 0 : index
    %257 = vector.load %arg9[%c1_184, %c1_185, %c0_186, %c0_187] : memref<2x2x32x16xf32, #tpu.memory_space<vmem>>, vector<1x1x32x16xf32>
    %258 = vector.shape_cast %257 : vector<1x1x32x16xf32> to vector<32x16xf32>
    %cst_188 = arith.constant dense<0.000000e+00> : vector<10x16xf32>
    %259 = tpu.matmul %208, %258, %cst_188 {dimension_numbers = #tpu.dot_dimension_numbers<[1], [0], [0], [1], [0, 0, 1, 1], [], []>} : vector<10x32xf32>, vector<32x16xf32>, vector<10x16xf32> -> vector<10x16xf32>
    %c1_189 = arith.constant 1 : index
    %c1_190 = arith.constant 1 : index
    %c0_191 = arith.constant 0 : index
    %c0_192 = arith.constant 0 : index
    %260 = vector.load %arg12[%c1_189, %c1_190, %c0_191, %c0_192] : memref<2x2x1x16xf32, #tpu.memory_space<vmem>>, vector<1x1x1x16xf32>
    %261 = vector.shape_cast %260 : vector<1x1x1x16xf32> to vector<1x16xf32>
    %262 = vector.broadcast %261 : vector<1x16xf32> to vector<10x16xf32>
    %263 = arith.addf %259, %262 : vector<10x16xf32>
    %c1_193 = arith.constant 1 : index
    %c1_194 = arith.constant 1 : index
    %c0_195 = arith.constant 0 : index
    %c0_196 = arith.constant 0 : index
    %264 = vector.load %arg10[%c1_193, %c1_194, %c0_195, %c0_196] : memref<2x2x32x16xf32, #tpu.memory_space<vmem>>, vector<1x1x32x16xf32>
    %265 = vector.shape_cast %264 : vector<1x1x32x16xf32> to vector<32x16xf32>
    %cst_197 = arith.constant dense<0.000000e+00> : vector<10x16xf32>
    %266 = tpu.matmul %208, %265, %cst_197 {dimension_numbers = #tpu.dot_dimension_numbers<[1], [0], [0], [1], [0, 0, 1, 1], [], []>} : vector<10x32xf32>, vector<32x16xf32>, vector<10x16xf32> -> vector<10x16xf32>
    %c1_198 = arith.constant 1 : index
    %c1_199 = arith.constant 1 : index
    %c0_200 = arith.constant 0 : index
    %c0_201 = arith.constant 0 : index
    %267 = vector.load %arg13[%c1_198, %c1_199, %c0_200, %c0_201] : memref<2x2x1x16xf32, #tpu.memory_space<vmem>>, vector<1x1x1x16xf32>
    %268 = vector.shape_cast %267 : vector<1x1x1x16xf32> to vector<1x16xf32>
    %269 = vector.broadcast %268 : vector<1x16xf32> to vector<10x16xf32>
    %270 = arith.addf %266, %269 : vector<10x16xf32>
    %cst_202 = arith.constant dense<0.000000e+00> : vector<10x10xf32>
    %271 = tpu.matmul %256, %263, %cst_202 {dimension_numbers = #tpu.dot_dimension_numbers<[1], [1], [0], [0], [0, 0, 1, 0], [], []>} : vector<10x16xf32>, vector<10x16xf32>, vector<10x10xf32> -> vector<10x10xf32>
    %cst_203 = arith.constant 2.500000e-01 : f32
    %272 = vector.broadcast %cst_203 : f32 to vector<10x10xf32>
    %273 = arith.mulf %271, %272 : vector<10x10xf32>
    %274 = arith.addf %273, %16 : vector<10x10xf32>
    %cst_204 = arith.constant dense<0xFF800000> : vector<10xf32>
    %275 = vector.multi_reduction <maximumf>, %274, %cst_204 [1] : vector<10x10xf32> to vector<10xf32>
    %276 = vector.shape_cast %275 : vector<10xf32> to vector<10x1xf32>
    %277 = vector.broadcast %276 : vector<10x1xf32> to vector<10x10xf32>
    %278 = arith.subf %274, %277 : vector<10x10xf32>
    %279 = math.exp %278 : vector<10x10xf32>
    %cst_205 = arith.constant dense<0.000000e+00> : vector<10xf32>
    %280 = vector.multi_reduction <add>, %279, %cst_205 [1] : vector<10x10xf32> to vector<10xf32>
    %281 = vector.shape_cast %280 : vector<10xf32> to vector<10x1xf32>
    %282 = tpu.reciprocal %281 {approx = true} : vector<10x1xf32> -> vector<10x1xf32>
    %283 = vector.broadcast %282 : vector<10x1xf32> to vector<10x10xf32>
    %284 = arith.mulf %279, %283 : vector<10x10xf32>
    %cst_206 = arith.constant dense<0.000000e+00> : vector<10x16xf32>
    %285 = tpu.matmul %284, %270, %cst_206 {dimension_numbers = #tpu.dot_dimension_numbers<[1], [0], [0], [1], [0, 0, 1, 1], [], []>} : vector<10x10xf32>, vector<10x16xf32>, vector<10x16xf32> -> vector<10x16xf32>
    %c1_207 = arith.constant 1 : index
    %c1_208 = arith.constant 1 : index
    %c0_209 = arith.constant 0 : index
    %c0_210 = arith.constant 0 : index
    %286 = vector.load %arg14[%c1_207, %c1_208, %c0_209, %c0_210] : memref<2x2x16x32xf32, #tpu.memory_space<vmem>>, vector<1x1x16x32xf32>
    %287 = vector.shape_cast %286 : vector<1x1x16x32xf32> to vector<16x32xf32>
    %cst_211 = arith.constant dense<0.000000e+00> : vector<10x32xf32>
    %288 = tpu.matmul %285, %287, %cst_211 {dimension_numbers = #tpu.dot_dimension_numbers<[1], [0], [0], [1], [0, 0, 1, 1], [], []>} : vector<10x16xf32>, vector<16x32xf32>, vector<10x32xf32> -> vector<10x32xf32>
    %289 = arith.addf %249, %288 : vector<10x32xf32>
    %290 = arith.addf %182, %289 : vector<10x32xf32>
    %c1_212 = arith.constant 1 : index
    %c0_213 = arith.constant 0 : index
    %c0_214 = arith.constant 0 : index
    %291 = vector.load %arg15[%c1_212, %c0_213, %c0_214] : memref<2x1x32xf32, #tpu.memory_space<vmem>>, vector<1x1x32xf32>
    %292 = vector.shape_cast %291 : vector<1x1x32xf32> to vector<1x32xf32>
    %293 = vector.broadcast %292 : vector<1x32xf32> to vector<10x32xf32>
    %294 = arith.addf %290, %293 : vector<10x32xf32>
    %c1_215 = arith.constant 1 : index
    %c0_216 = arith.constant 0 : index
    %c0_217 = arith.constant 0 : index
    %295 = vector.load %arg16[%c1_215, %c0_216, %c0_217] : memref<2x1x32xf32, #tpu.memory_space<vmem>>, vector<1x1x32xf32>
    %296 = vector.shape_cast %295 : vector<1x1x32xf32> to vector<1x32xf32>
    %c1_218 = arith.constant 1 : index
    %c0_219 = arith.constant 0 : index
    %c0_220 = arith.constant 0 : index
    %297 = vector.load %arg17[%c1_218, %c0_219, %c0_220] : memref<2x1x32xf32, #tpu.memory_space<vmem>>, vector<1x1x32xf32>
    %298 = vector.shape_cast %297 : vector<1x1x32xf32> to vector<1x32xf32>
    %cst_221 = arith.constant dense<0.000000e+00> : vector<10xf32>
    %299 = vector.multi_reduction <add>, %294, %cst_221 [1] : vector<10x32xf32> to vector<10xf32>
    %300 = vector.shape_cast %299 : vector<10xf32> to vector<10x1xf32>
    %cst_222 = arith.constant 3.200000e+01 : f32
    %301 = vector.broadcast %cst_222 : f32 to vector<10x1xf32>
    %302 = arith.divf %300, %301 : vector<10x1xf32>
    %303 = vector.broadcast %302 : vector<10x1xf32> to vector<10x32xf32>
    %304 = arith.subf %294, %303 : vector<10x32xf32>
    %305 = arith.mulf %304, %304 : vector<10x32xf32>
    %cst_223 = arith.constant dense<0.000000e+00> : vector<10xf32>
    %306 = vector.multi_reduction <add>, %305, %cst_223 [1] : vector<10x32xf32> to vector<10xf32>
    %307 = vector.shape_cast %306 : vector<10xf32> to vector<10x1xf32>
    %cst_224 = arith.constant 3.200000e+01 : f32
    %308 = vector.broadcast %cst_224 : f32 to vector<10x1xf32>
    %309 = arith.divf %307, %308 : vector<10x1xf32>
    %310 = vector.broadcast %302 : vector<10x1xf32> to vector<10x32xf32>
    %311 = arith.subf %294, %310 : vector<10x32xf32>
    %cst_225 = arith.constant 9.99999997E-7 : f32
    %312 = vector.broadcast %cst_225 : f32 to vector<10x1xf32>
    %313 = arith.addf %309, %312 : vector<10x1xf32>
    %314 = math.rsqrt %313 : vector<10x1xf32>
    %315 = vector.broadcast %314 : vector<10x1xf32> to vector<10x32xf32>
    %316 = arith.mulf %311, %315 : vector<10x32xf32>
    %317 = vector.broadcast %296 : vector<1x32xf32> to vector<10x32xf32>
    %318 = arith.mulf %316, %317 : vector<10x32xf32>
    %319 = vector.broadcast %298 : vector<1x32xf32> to vector<10x32xf32>
    %320 = arith.addf %318, %319 : vector<10x32xf32>
    %c1_226 = arith.constant 1 : index
    %c0_227 = arith.constant 0 : index
    %c0_228 = arith.constant 0 : index
    %321 = vector.load %arg18[%c1_226, %c0_227, %c0_228] : memref<2x32x64xf32, #tpu.memory_space<vmem>>, vector<1x32x64xf32>
    %322 = vector.shape_cast %321 : vector<1x32x64xf32> to vector<32x64xf32>
    %cst_229 = arith.constant dense<0.000000e+00> : vector<10x64xf32>
    %323 = tpu.matmul %320, %322, %cst_229 {dimension_numbers = #tpu.dot_dimension_numbers<[1], [0], [0], [1], [0, 0, 1, 1], [], []>} : vector<10x32xf32>, vector<32x64xf32>, vector<10x64xf32> -> vector<10x64xf32>
    %c1_230 = arith.constant 1 : index
    %c0_231 = arith.constant 0 : index
    %c0_232 = arith.constant 0 : index
    %324 = vector.load %arg19[%c1_230, %c0_231, %c0_232] : memref<2x1x64xf32, #tpu.memory_space<vmem>>, vector<1x1x64xf32>
    %325 = vector.shape_cast %324 : vector<1x1x64xf32> to vector<1x64xf32>
    %326 = vector.broadcast %325 : vector<1x64xf32> to vector<10x64xf32>
    %327 = arith.addf %323, %326 : vector<10x64xf32>
    %328 = arith.mulf %327, %327 : vector<10x64xf32>
    %329 = arith.mulf %327, %328 : vector<10x64xf32>
    %cst_233 = arith.constant 4.471500e-02 : f32
    %330 = vector.broadcast %cst_233 : f32 to vector<10x64xf32>
    %331 = arith.mulf %330, %329 : vector<10x64xf32>
    %332 = arith.addf %327, %331 : vector<10x64xf32>
    %cst_234 = arith.constant 0.797884583 : f32
    %333 = vector.broadcast %cst_234 : f32 to vector<10x64xf32>
    %334 = arith.mulf %333, %332 : vector<10x64xf32>
    %335 = math.tanh %334 : vector<10x64xf32>
    %cst_235 = arith.constant 1.000000e+00 : f32
    %336 = vector.broadcast %cst_235 : f32 to vector<10x64xf32>
    %337 = arith.addf %336, %335 : vector<10x64xf32>
    %cst_236 = arith.constant 5.000000e-01 : f32
    %338 = vector.broadcast %cst_236 : f32 to vector<10x64xf32>
    %339 = arith.mulf %338, %337 : vector<10x64xf32>
    %340 = arith.mulf %327, %339 : vector<10x64xf32>
    %c1_237 = arith.constant 1 : index
    %c0_238 = arith.constant 0 : index
    %c0_239 = arith.constant 0 : index
    %341 = vector.load %arg20[%c1_237, %c0_238, %c0_239] : memref<2x64x32xf32, #tpu.memory_space<vmem>>, vector<1x64x32xf32>
    %342 = vector.shape_cast %341 : vector<1x64x32xf32> to vector<64x32xf32>
    %cst_240 = arith.constant dense<0.000000e+00> : vector<10x32xf32>
    %343 = tpu.matmul %340, %342, %cst_240 {dimension_numbers = #tpu.dot_dimension_numbers<[1], [0], [0], [1], [0, 0, 1, 1], [], []>} : vector<10x64xf32>, vector<64x32xf32>, vector<10x32xf32> -> vector<10x32xf32>
    %344 = arith.addf %294, %343 : vector<10x32xf32>
    %c1_241 = arith.constant 1 : index
    %c0_242 = arith.constant 0 : index
    %c0_243 = arith.constant 0 : index
    %345 = vector.load %arg21[%c1_241, %c0_242, %c0_243] : memref<2x1x32xf32, #tpu.memory_space<vmem>>, vector<1x1x32xf32>
    %346 = vector.shape_cast %345 : vector<1x1x32xf32> to vector<1x32xf32>
    %347 = vector.broadcast %346 : vector<1x32xf32> to vector<10x32xf32>
    %348 = arith.addf %344, %347 : vector<10x32xf32>
    %349 = vector.extract_strided_slice %348 {offsets = [0, 0], sizes = [1, 32], strides = [1, 1]} : vector<10x32xf32> to vector<1x32xf32>
    %350 = vector.extract_strided_slice %348 {offsets = [5, 0], sizes = [1, 32], strides = [1, 1]} : vector<10x32xf32> to vector<1x32xf32>
    %351 = tpu.concatenate %349, %350 in 0 : vector<1x32xf32>, vector<1x32xf32> -> vector<2x32xf32>
    %c0_244 = arith.constant 0 : index
    %c0_245 = arith.constant 0 : index
    %352 = vector.load %arg22[%c0_244, %c0_245] : memref<1x32xf32, #tpu.memory_space<vmem>>, vector<1x32xf32>
    %c0_246 = arith.constant 0 : index
    %c0_247 = arith.constant 0 : index
    %353 = vector.load %arg23[%c0_246, %c0_247] : memref<1x32xf32, #tpu.memory_space<vmem>>, vector<1x32xf32>
    %cst_248 = arith.constant dense<0.000000e+00> : vector<2xf32>
    %354 = vector.multi_reduction <add>, %351, %cst_248 [1] : vector<2x32xf32> to vector<2xf32>
    %355 = vector.shape_cast %354 : vector<2xf32> to vector<2x1xf32>
    %cst_249 = arith.constant 3.200000e+01 : f32
    %356 = vector.broadcast %cst_249 : f32 to vector<2x1xf32>
    %357 = arith.divf %355, %356 : vector<2x1xf32>
    %358 = vector.broadcast %357 : vector<2x1xf32> to vector<2x32xf32>
    %359 = arith.subf %351, %358 : vector<2x32xf32>
    %360 = arith.mulf %359, %359 : vector<2x32xf32>
    %cst_250 = arith.constant dense<0.000000e+00> : vector<2xf32>
    %361 = vector.multi_reduction <add>, %360, %cst_250 [1] : vector<2x32xf32> to vector<2xf32>
    %362 = vector.shape_cast %361 : vector<2xf32> to vector<2x1xf32>
    %cst_251 = arith.constant 3.200000e+01 : f32
    %363 = vector.broadcast %cst_251 : f32 to vector<2x1xf32>
    %364 = arith.divf %362, %363 : vector<2x1xf32>
    %365 = vector.broadcast %357 : vector<2x1xf32> to vector<2x32xf32>
    %366 = arith.subf %351, %365 : vector<2x32xf32>
    %cst_252 = arith.constant 9.99999997E-7 : f32
    %367 = vector.broadcast %cst_252 : f32 to vector<2x1xf32>
    %368 = arith.addf %364, %367 : vector<2x1xf32>
    %369 = math.rsqrt %368 : vector<2x1xf32>
    %370 = vector.broadcast %369 : vector<2x1xf32> to vector<2x32xf32>
    %371 = arith.mulf %366, %370 : vector<2x32xf32>
    %372 = vector.broadcast %352 : vector<1x32xf32> to vector<2x32xf32>
    %373 = arith.mulf %371, %372 : vector<2x32xf32>
    %374 = vector.broadcast %353 : vector<1x32xf32> to vector<2x32xf32>
    %375 = arith.addf %373, %374 : vector<2x32xf32>
    %c0_253 = arith.constant 0 : index
    %c0_254 = arith.constant 0 : index
    %376 = vector.load %arg24[%c0_253, %c0_254] : memref<32x128xf32, #tpu.memory_space<vmem>>, vector<32x128xf32>
    %cst_255 = arith.constant dense<0.000000e+00> : vector<2x128xf32>
    %377 = tpu.matmul %375, %376, %cst_255 {dimension_numbers = #tpu.dot_dimension_numbers<[1], [0], [0], [1], [0, 0, 1, 1], [], []>} : vector<2x32xf32>, vector<32x128xf32>, vector<2x128xf32> -> vector<2x128xf32>
    %c0_256 = arith.constant 0 : index
    %c0_257 = arith.constant 0 : index
    %378 = vector.load %arg25[%c0_256, %c0_257] : memref<1x128xf32, #tpu.memory_space<vmem>>, vector<1x128xf32>
    %379 = vector.broadcast %378 : vector<1x128xf32> to vector<2x128xf32>
    %380 = arith.addf %377, %379 : vector<2x128xf32>
    %381 = arith.negf %380 : vector<2x128xf32>
    %382 = math.exp %381 : vector<2x128xf32>
    %cst_258 = arith.constant 1.000000e+00 : f32
    %383 = vector.broadcast %cst_258 : f32 to vector<2x128xf32>
    %384 = arith.addf %383, %382 : vector<2x128xf32>
    %385 = arith.divf %383, %384 : vector<2x128xf32>
    %c0_259 = arith.constant 0 : index
    %c0_260 = arith.constant 0 : index
    %386 = vector.load %arg26[%c0_259, %c0_260] : memref<2x128xf32, #tpu.memory_space<vmem>>, vector<2x128xf32>
    tpu.vector_store %arg26[%c0_259, %c0_260], %385 {strides = array<i32>} : memref<2x128xf32, #tpu.memory_space<vmem>>, vector<2x128xf32>,
    return
  }
  func.func @transform_0(%arg0: i32) -> (i32, i32) {
    %c0_i32 = arith.constant 0 : i32
    %c0_i32_0 = arith.constant 0 : i32
    %c0_i32_1 = arith.constant 0 : i32
    return %c0_i32, %c0_i32_0 : i32, i32
  }
  func.func @transform_1(%arg0: i32) -> (i32, i32) {
    %c0_i32 = arith.constant 0 : i32
    %c0_i32_0 = arith.constant 0 : i32
    %c0_i32_1 = arith.constant 0 : i32
    return %c0_i32, %c0_i32_0 : i32, i32
  }
  func.func @transform_2(%arg0: i32) -> (i32, i32) {
    %c0_i32 = arith.constant 0 : i32
    %c0_i32_0 = arith.constant 0 : i32
    %c0_i32_1 = arith.constant 0 : i32
    return %c0_i32, %c0_i32_0 : i32, i32
  }
  func.func @transform_3(%arg0: i32) -> (i32, i32) {
    %c0_i32 = arith.constant 0 : i32
    %c0_i32_0 = arith.constant 0 : i32
    %c0_i32_1 = arith.constant 0 : i32
    return %c0_i32, %c0_i32_0 : i32, i32
  }
  func.func @transform_4(%arg0: i32) -> (i32, i32) {
    %c0_i32 = arith.constant 0 : i32
    %c0_i32_0 = arith.constant 0 : i32
    %c0_i32_1 = arith.constant 0 : i32
    return %c0_i32, %c0_i32_0 : i32, i32
  }
  func.func @transform_5(%arg0: i32) -> (i32, i32, i32) {
    %c0_i32 = arith.constant 0 : i32
    %c0_i32_0 = arith.constant 0 : i32
    %c0_i32_1 = arith.constant 0 : i32
    %c0_i32_2 = arith.constant 0 : i32
    return %c0_i32, %c0_i32_0, %c0_i32_1 : i32, i32, i32
  }
  func.func @transform_6(%arg0: i32) -> (i32, i32, i32) {
    %c0_i32 = arith.constant 0 : i32
    %c0_i32_0 = arith.constant 0 : i32
    %c0_i32_1 = arith.constant 0 : i32
    %c0_i32_2 = arith.constant 0 : i32
    return %c0_i32, %c0_i32_0, %c0_i32_1 : i32, i32, i32
  }
  func.func @transform_7(%arg0: i32) -> (i32, i32, i32, i32) {
    %c0_i32 = arith.constant 0 : i32
    %c0_i32_0 = arith.constant 0 : i32
    %c0_i32_1 = arith.constant 0 : i32
    %c0_i32_2 = arith.constant 0 : i32
    %c0_i32_3 = arith.constant 0 : i32
    return %c0_i32, %c0_i32_0, %c0_i32_1, %c0_i32_2 : i32, i32, i32, i32
  }
  func.func @transform_8(%arg0: i32) -> (i32, i32, i32, i32) {
    %c0_i32 = arith.constant 0 : i32
    %c0_i32_0 = arith.constant 0 : i32
    %c0_i32_1 = arith.constant 0 : i32
    %c0_i32_2 = arith.constant 0 : i32
    %c0_i32_3 = arith.constant 0 : i32
    return %c0_i32, %c0_i32_0, %c0_i32_1, %c0_i32_2 : i32, i32, i32, i32
  }
  func.func @transform_9(%arg0: i32) -> (i32, i32, i32, i32) {
    %c0_i32 = arith.constant 0 : i32
    %c0_i32_0 = arith.constant 0 : i32
    %c0_i32_1 = arith.constant 0 : i32
    %c0_i32_2 = arith.constant 0 : i32
    %c0_i32_3 = arith.constant 0 : i32
    return %c0_i32, %c0_i32_0, %c0_i32_1, %c0_i32_2 : i32, i32, i32, i32
  }
  func.func @transform_10(%arg0: i32) -> (i32, i32, i32, i32) {
    %c0_i32 = arith.constant 0 : i32
    %c0_i32_0 = arith.constant 0 : i32
    %c0_i32_1 = arith.constant 0 : i32
    %c0_i32_2 = arith.constant 0 : i32
    %c0_i32_3 = arith.constant 0 : i32
    return %c0_i32, %c0_i32_0, %c0_i32_1, %c0_i32_2 : i32, i32, i32, i32
  }
  func.func @transform_11(%arg0: i32) -> (i32, i32, i32, i32) {
    %c0_i32 = arith.constant 0 : i32
    %c0_i32_0 = arith.constant 0 : i32
    %c0_i32_1 = arith.constant 0 : i32
    %c0_i32_2 = arith.constant 0 : i32
    %c0_i32_3 = arith.constant 0 : i32
    return %c0_i32, %c0_i32_0, %c0_i32_1, %c0_i32_2 : i32, i32, i32, i32
  }
  func.func @transform_12(%arg0: i32) -> (i32, i32, i32, i32) {
    %c0_i32 = arith.constant 0 : i32
    %c0_i32_0 = arith.constant 0 : i32
    %c0_i32_1 = arith.constant 0 : i32
    %c0_i32_2 = arith.constant 0 : i32
    %c0_i32_3 = arith.constant 0 : i32
    return %c0_i32, %c0_i32_0, %c0_i32_1, %c0_i32_2 : i32, i32, i32, i32
  }
  func.func @transform_13(%arg0: i32) -> (i32, i32, i32, i32) {
    %c0_i32 = arith.constant 0 : i32
    %c0_i32_0 = arith.constant 0 : i32
    %c0_i32_1 = arith.constant 0 : i32
    %c0_i32_2 = arith.constant 0 : i32
    %c0_i32_3 = arith.constant 0 : i32
    return %c0_i32, %c0_i32_0, %c0_i32_1, %c0_i32_2 : i32, i32, i32, i32
  }
  func.func @transform_14(%arg0: i32) -> (i32, i32, i32) {
    %c0_i32 = arith.constant 0 : i32
    %c0_i32_0 = arith.constant 0 : i32
    %c0_i32_1 = arith.constant 0 : i32
    %c0_i32_2 = arith.constant 0 : i32
    return %c0_i32, %c0_i32_0, %c0_i32_1 : i32, i32, i32
  }
  func.func @transform_15(%arg0: i32) -> (i32, i32, i32) {
    %c0_i32 = arith.constant 0 : i32
    %c0_i32_0 = arith.constant 0 : i32
    %c0_i32_1 = arith.constant 0 : i32
    %c0_i32_2 = arith.constant 0 : i32
    return %c0_i32, %c0_i32_0, %c0_i32_1 : i32, i32, i32
  }
  func.func @transform_16(%arg0: i32) -> (i32, i32, i32) {
    %c0_i32 = arith.constant 0 : i32
    %c0_i32_0 = arith.constant 0 : i32
    %c0_i32_1 = arith.constant 0 : i32
    %c0_i32_2 = arith.constant 0 : i32
    return %c0_i32, %c0_i32_0, %c0_i32_1 : i32, i32, i32
  }
  func.func @transform_17(%arg0: i32) -> (i32, i32, i32) {
    %c0_i32 = arith.constant 0 : i32
    %c0_i32_0 = arith.constant 0 : i32
    %c0_i32_1 = arith.constant 0 : i32
    %c0_i32_2 = arith.constant 0 : i32
    return %c0_i32, %c0_i32_0, %c0_i32_1 : i32, i32, i32
  }
  func.func @transform_18(%arg0: i32) -> (i32, i32, i32) {
    %c0_i32 = arith.constant 0 : i32
    %c0_i32_0 = arith.constant 0 : i32
    %c0_i32_1 = arith.constant 0 : i32
    %c0_i32_2 = arith.constant 0 : i32
    return %c0_i32, %c0_i32_0, %c0_i32_1 : i32, i32, i32
  }
  func.func @transform_19(%arg0: i32) -> (i32, i32, i32) {
    %c0_i32 = arith.constant 0 : i32
    %c0_i32_0 = arith.constant 0 : i32
    %c0_i32_1 = arith.constant 0 : i32
    %c0_i32_2 = arith.constant 0 : i32
    return %c0_i32, %c0_i32_0, %c0_i32_1 : i32, i32, i32
  }
  func.func @transform_20(%arg0: i32) -> (i32, i32, i32) {
    %c0_i32 = arith.constant 0 : i32
    %c0_i32_0 = arith.constant 0 : i32
    %c0_i32_1 = arith.constant 0 : i32
    %c0_i32_2 = arith.constant 0 : i32
    return %c0_i32, %c0_i32_0, %c0_i32_1 : i32, i32, i32
  }
  func.func @transform_21(%arg0: i32) -> (i32, i32) {
    %c0_i32 = arith.constant 0 : i32
    %c0_i32_0 = arith.constant 0 : i32
    %c0_i32_1 = arith.constant 0 : i32
    return %c0_i32, %c0_i32_0 : i32, i32
  }
  func.func @transform_22(%arg0: i32) -> (i32, i32) {
    %c0_i32 = arith.constant 0 : i32
    %c0_i32_0 = arith.constant 0 : i32
    %c0_i32_1 = arith.constant 0 : i32
    return %c0_i32, %c0_i32_0 : i32, i32
  }
  func.func @transform_23(%arg0: i32) -> (i32, i32) {
    %c0_i32 = arith.constant 0 : i32
    %c0_i32_0 = arith.constant 0 : i32
    %c0_i32_1 = arith.constant 0 : i32
    return %c0_i32, %c0_i32_0 : i32, i32
  }
  func.func @transform_24(%arg0: i32) -> (i32, i32) {
    %c0_i32 = arith.constant 0 : i32
    %c0_i32_0 = arith.constant 0 : i32
    %c0_i32_1 = arith.constant 0 : i32
    return %c0_i32, %c0_i32_0 : i32, i32
  }
  func.func @transform_25(%arg0: i32) -> (i32, i32) {
    %c0_i32 = arith.constant 0 : i32
    %c0_i32_0 = arith.constant 0 : i32
    %c0_i32_1 = arith.constant 0 : i32
    return %c0_i32, %c0_i32_0 : i32, i32
  }
}

</mosaic_0001>

<bundles_post_ra>
// kernel: multi_head_vit_forward.1
= control target key start
LH: loop header
LB: loop body
LE: loop exit
PB: predicated region body
PF: predicated region fallthrough
CT: control target
= control target key end

     0   :  { %vm110_vm0 = vcmask 523264   ;;  %vm170_vm1 = vcmask 1040384   ;;  %vm172_vm2 = vcmask 1044480   ;;  %vm174_vm3 = vcmask 1045504   ;;  %s2622_s1 = inlined_call_operand.vmem [shape: f32[192,32], index: 1, kind: input, shape index: {}]   ;;  %s2623_s2 = inlined_call_operand.vmem [shape: f32[1,32], index: 2, kind: input, shape index: {}]   ;;  %s2624_s0 = inlined_call_operand.vmem [shape: f32[8,192], index: 0, kind: input, shape index: {}]   ;;  %s2625_s3 = inlined_call_operand.vmem [shape: f32[5,32], index: 3, kind: input, shape index: {}]   ;;  %s2626_s5 = inlined_call_operand.vmem [shape: f32[2,1,32], index: 5, kind: input, shape index: {}]   ;;  %s2627_s6 = inlined_call_operand.vmem [shape: f32[2,1,32], index: 6, kind: input, shape index: {}]   ;;  %s2628_s12 = inlined_call_operand.vmem [shape: f32[2,2,1,16], index: 12, kind: input, shape index: {}]   ;;  %s2629_s7 = inlined_call_operand.vmem [shape: f32[2,2,32,16], index: 7, kind: input, shape index: {}]   ;;  %s2630_s8 = inlined_call_operand.vmem [shape: f32[2,2,32,16], index: 8, kind: input, shape index: {}]   ;;  %s2631_s9 = inlined_call_operand.vmem [shape: f32[2,2,32,16], index: 9, kind: input, shape index: {}]   ;;  %s2632_s10 = inlined_call_operand.vmem [shape: f32[2,2,1,16], index: 10, kind: input, shape index: {}]   ;;  %s2633_s11 = inlined_call_operand.vmem [shape: f32[2,2,1,16], index: 11, kind: input, shape index: {}]   ;;  %s2634_s4 = inlined_call_operand.vmem [shape: f32[10,10], index: 4, kind: input, shape index: {}]   ;;  %s2635_s13 = inlined_call_operand.vmem [shape: f32[2,2,16,32], index: 13, kind: input, shape index: {}]   ;;  %s2636_s14 = inlined_call_operand.vmem [shape: f32[2,1,32], index: 14, kind: input, shape index: {}]   ;;  %s2637_s15 = inlined_call_operand.vmem [shape: f32[2,1,32], index: 15, kind: input, shape index: {}]   ;;  %s2638_s16 = inlined_call_operand.vmem [shape: f32[2,1,32], index: 16, kind: input, shape index: {}]   ;;  %s2639_s18 = inlined_call_operand.vmem [shape: f32[2,1,64], index: 18, kind: input, shape index: {}]   ;;  %s2640_s17 = inlined_call_operand.vmem [shape: f32[2,32,64], index: 17, kind: input, shape index: {}]   ;;  %s2641_s20 = inlined_call_operand.vmem [shape: f32[2,1,32], index: 20, kind: input, shape index: {}]   ;;  %s2642_s19 = inlined_call_operand.vmem [shape: f32[2,64,32], index: 19, kind: input, shape index: {}]   ;;  %s2643_s21 = inlined_call_operand.vmem [shape: f32[1,32], index: 21, kind: input, shape index: {}]   ;;  %s2644_s22 = inlined_call_operand.vmem [shape: f32[1,32], index: 22, kind: input, shape index: {}]   ;;  %s2645_s24 = inlined_call_operand.vmem [shape: f32[1,128], index: 24, kind: input, shape index: {}]   ;;  %s2646_s23 = inlined_call_operand.vmem [shape: f32[32,128], index: 23, kind: input, shape index: {}]   ;;  %s2647_s25 = inlined_call_operand.vmem [shape: f32[2,128], index: 25, kind: output, shape index: {}]  }
   0x1   :  { %2656 = sst [smem:[#allocation2_spill]] %s2622_s1  ;;  %vm180_vm4 = vcmask 261120   ;;  %vm184_vm5 = vcmask 254976   ;;  %v1865_v44 = vmov 32.0   ;;  %vm412_vm13 = vcmask 1041408  }
   0x2   :  { %2657 = sst [smem:[#allocation3_spill]] %s2623_s2  ;;  %1801 = vrcp.f32 %v1865_v44  ;;  %vm342_vm14 = vcmask 130048   ;;  %vm382_vm15 = vcmask 80896  }
   0x3   :  { %2658 = sst [smem:[#allocation4_spill]] %s2624_s0 }
   0x4   :  { %2659 = sst [smem:[#allocation5_spill]] %s2625_s3 }
   0x5   :  { %2660 = sst [smem:[#allocation6_spill]] %s2626_s5 }
   0x6   :  { %2661 = sst [smem:[#allocation7_spill]] %s2627_s6 }
   0x7   :  { %2662 = sst [smem:[#allocation8_spill]] %s2628_s12 }
   0x8   :  { %2663 = sst [smem:[#allocation9_spill]] %s2629_s7  ;;  %v1802_v45 = vpop.eup %1801 }
   0x9   :  { %2664 = sst [smem:[#allocation10_spill]] %s2630_s8  ;;  %v189_v46 = vmul.f32 32.0, %v1802_v45  ;;  %vm193_vm6 = vweird.f32 %v1802_v45 }
   0xa   :  { %2665 = sst [smem:[#allocation11_spill]] %s2631_s9 }
   0xb   :  { %s2666_s12 = sld [smem:[#allocation2_spill]]  ;;  %v190_v47 = vsub.f32 1.0, %v189_v46 }
   0xc   :  { %s2667_s28 = sld [smem:[#allocation4_spill]] }
   0xd   :  { %s2668_s29 = sld [smem:[#allocation3_spill]]  ;;  %v191_v48 = vmul.f32 %v1802_v45, %v190_v47 }
   0xe   :  { %s2669_s7 = sld [smem:[#allocation5_spill]] }
   0xf   :  { %v192_v49 = vadd.f32 %v1802_v45, %v191_v48  ;;  %s2670_s3 = sld [smem:[#allocation9_spill]] }
  0x10   :  { %s2671_s8 = sld [smem:[#allocation10_spill]] }
  0x11   :  { %v97_v0 = vld [vmem:[%s2666_s12 + $0x78] sm:$0xff]  ;;  %v96_v1 = vld [vmem:[%s2666_s12 + $0x70] sm:$0xff]  ;;  %v95_v2 = vld [vmem:[%s2666_s12 + $0x68] sm:$0xff]  ;;  %v2091_v50 = vsel %vm193_vm6, %v1802_v45, %v192_v49  ;;  %s2672_s9 = sld [smem:[#allocation11_spill]] }
  0x12   :  { %114 = vmatpush.msra.mxu0 %v97_v0  ;;  %v105_v3 = vld [vmem:[%s2666_s12 + $0xb8] sm:$0xff]  ;;  %v94_v4 = vld [vmem:[%s2666_s12 + $0x60] sm:$0xff]  ;;  %v104_v5 = vld [vmem:[%s2666_s12 + $0xb0] sm:$0xff]  ;;  %s2673_s6 = sld [smem:[#allocation6_spill]] }
  0x13   :  { %142 = vmatpush.msra.mxu1 %v105_v3  ;;  %v103_v6 = vld [vmem:[%s2666_s12 + $0xa8] sm:$0xff]  ;;  %v93_v7 = vld [vmem:[%s2666_s12 + $0x58] sm:$0xff]  ;;  %v102_v8 = vld [vmem:[%s2666_s12 + $0xa0] sm:$0xff]  ;;  %s2674_s1 = sld [smem:[#allocation7_spill]] }
  0x14   :  { %115 = vmatpush.msra.mxu0 %v96_v1  ;;  %v92_v9 = vld [vmem:[%s2666_s12 + $0x50] sm:$0xff]  ;;  %v101_v10 = vld [vmem:[%s2666_s12 + $0x98] sm:$0xff]  ;;  %v91_v11 = vld [vmem:[%s2666_s12 + $0x48] sm:$0xff] }
  0x15   :  { %143 = vmatpush.msra.mxu1 %v104_v5  ;;  %v100_v12 = vld [vmem:[%s2666_s12 + $0x90] sm:$0xff]  ;;  %v90_v13 = vld [vmem:[%s2666_s12 + $0x40] sm:$0xff]  ;;  %v99_v14 = vld [vmem:[%s2666_s12 + $0x88] sm:$0xff] }
  0x16   :  { %116 = vmatpush.msra.mxu0 %v95_v2  ;;  %v89_v15 = vld [vmem:[%s2666_s12 + $0x38] sm:$0xff]  ;;  %v98_v16 = vld [vmem:[%s2666_s12 + $0x80] sm:$0xff]  ;;  %v88_v17 = vld [vmem:[%s2666_s12 + $0x30] sm:$0xff] }
  0x17   :  { %144 = vmatpush.msra.mxu1 %v103_v6  ;;  %v81_v18 = vld [vmem:[%s2667_s28 + $0x8] sm:$0xff]  ;;  %v86_v20 = vld [vmem:[%s2666_s12 + $0x20] sm:$0xff]  ;;  %v85_v21 = vld [vmem:[%s2666_s12 + $0x18] sm:$0xff] }
  0x18   :  { %117 = vmatpush.msra.mxu0 %v94_v4  ;;  %v87_v19 = vld [vmem:[%s2666_s12 + $0x28] sm:$0xff]  ;;  %v84_v22 = vld [vmem:[%s2666_s12 + $0x10] sm:$0xff]  ;;  %v82_v24 = vld [vmem:[%s2666_s12] sm:$0xff] }
  0x19   :  { %145 = vmatpush.msra.mxu1 %v102_v8  ;;  %v83_v23 = vld [vmem:[%s2666_s12 + $0x8] sm:$0xff]  ;;  %v80_v25 = vld [vmem:[%s2667_s28] sm:$0xff]  ;;  %v246_v61 = vld [vmem:[%s2670_s3 + $0x18] sm:$0xff]  ;;  %s2675_s12 = sld [smem:[#allocation8_spill]] }
  0x1a   :  { %118 = vmatpush.msra.mxu0 %v93_v7  ;;  %v1771_v26 = vld [vmem:[%s2668_s29] ss:$0 sm:$0xff]  ;;  %v283_v62 = vld [vmem:[%s2671_s8 + $0x18] sm:$0xff]  ;;  %269 = vmatpush.msra.mxu2 %v246_v61  ;;  %v245_v1 = vld [vmem:[%s2670_s3 + $0x10] sm:$0xff] }
  0x1b   :  { %146 = vmatpush.msra.mxu1 %v101_v10  ;;  %v154_v27 = vld [vmem:[%s2669_s7] sm:$0x1f]  ;;  %v314_v63 = vld [vmem:[%s2672_s9 + $0x18] sm:$0xff]  ;;  %300 = vmatpush.msra.mxu3 %v283_v62  ;;  %v282_v2 = vld [vmem:[%s2671_s8 + $0x10] sm:$0xff] }
  0x1c   :  { %119 = vmatpush.msra.mxu0 %v92_v9  ;;  %v156_v31 = vrot.slane %v154_v27, 1  ;;  %v159_v32 = vrot.slane %v154_v27, 5  ;;  %v165_v36 = vrot.slane %v154_v27, 3  ;;  %v1646_v0 = vld [vmem:[%s2670_s3 + $0x38] sm:$0xff]  ;;  %v313_v3 = vld [vmem:[%s2672_s9 + $0x10] sm:$0xff]  ;;  %270 = vmatpush.msra.mxu2 %v245_v1  ;;  %v244_v5 = vld [vmem:[%s2670_s3 + $0x8] sm:$0xff] }
  0x1d   :  { %147 = vmatpush.msra.mxu1 %v100_v12  ;;  %301 = vmatpush.msra.mxu3 %v282_v2  ;;  %v1645_v4 = vld [vmem:[%s2670_s3 + $0x30] sm:$0xff]  ;;  %v281_v6 = vld [vmem:[%s2671_s8 + $0x8] sm:$0xff]  ;;  %v243_v9 = vld [vmem:[%s2670_s3] sm:$0xff] }
  0x1e   :  { %120 = vmatpush.msra.mxu0 %v91_v11  ;;  %v312_v7 = vld [vmem:[%s2672_s9 + $0x8] sm:$0xff]  ;;  %271 = vmatpush.msra.mxu2 %v244_v5  ;;  %v280_v10 = vld [vmem:[%s2671_s8] sm:$0xff]  ;;  %v1660_v61 = vld [vmem:[%s2672_s9 + $0x38] sm:$0xff] }
  0x1f   :  { %148 = vmatpush.msra.mxu1 %v99_v14  ;;  %302 = vmatpush.msra.mxu3 %v281_v6  ;;  %v1644_v8 = vld [vmem:[%s2670_s3 + $0x28] sm:$0xff]  ;;  %v311_v11 = vld [vmem:[%s2672_s9] sm:$0xff] }
  0x20   :  { %121 = vmatpush.msra.mxu0 %v90_v13  ;;  %272 = vmatpush.msra.mxu2 %v243_v9  ;;  %v1643_v12 = vld [vmem:[%s2670_s3 + $0x20] sm:$0xff]  ;;  %v1658_v1 = vld [vmem:[%s2672_s9 + $0x28] sm:$0xff] }
  0x21   :  { %149 = vmatpush.msra.mxu1 %v98_v16  ;;  %303 = vmatpush.msra.mxu3 %v280_v10  ;;  %v1653_v16 = vld [vmem:[%s2671_s8 + $0x38] sm:$0xff]  ;;  %v1774_v49 = vld [vmem:[%s2675_s12] ss:$0 sm:$0xff] }
  0x22   :  { %122 = vmatpush.msra.mxu0 %v89_v15  ;;  %1629 = vmatmul.msk.f32.vlgmr.msra.gmra.mxu1 %vm110_vm0, %v81_v18  ;;  %v2223_v9 = vld [vmem:[%s2634_s4] sm:$0xff] }
  0x23   :  { %331 = vmatpush.msrb.mxu1 %v314_v63  ;;  %v1659_v63 = vld [vmem:[%s2672_s9 + $0x30] sm:$0xff] }
  0x24   :  { %123 = vmatpush.msra.mxu0 %v88_v17  ;;  %v1652_v17 = vld [vmem:[%s2671_s8 + $0x30] sm:$0xff] }
  0x25   :  { %332 = vmatpush.msrb.mxu1 %v313_v3 }
  0x26   :  { %124 = vmatpush.msra.mxu0 %v87_v19  ;;  %v1651_v19 = vld [vmem:[%s2671_s8 + $0x28] sm:$0xff] }
  0x27   :  { %333 = vmatpush.msrb.mxu1 %v312_v7 }
  0x28   :  { %125 = vmatpush.msra.mxu0 %v86_v20 }
  0x29   :  { %334 = vmatpush.msrb.mxu1 %v311_v11 }
  0x2a   :  { %126 = vmatpush.msra.mxu0 %v85_v21  ;;  %v1650_v21 = vld [vmem:[%s2671_s8 + $0x20] sm:$0xff] }
  0x2b   :  { %496 = vmatpush.msra.mxu1 %v1653_v16 }
  0x2c   :  { %127 = vmatpush.msra.mxu0 %v84_v22 }
  0x2d   :  { %497 = vmatpush.msra.mxu1 %v1652_v17 }
  0x2e   :  { %128 = vmatpush.msra.mxu0 %v83_v23 }
  0x2f   :  { %498 = vmatpush.msra.mxu1 %v1651_v19  ;;  %v1779_v19 = vld [vmem:[%s2675_s12 + $0x1] ss:$0 sm:$0xff] }
  0x30   :  { %129 = vmatpush.msra.mxu0 %v82_v24 }
  0x31   :  { %130 = vmatmul.f32.vlgmr.msra.gmra.mxu0 %v80_v25  ;;  %499 = vmatpush.msra.mxu1 %v1650_v21 }
  0x32   :  { %463 = vmatpush.msrb.mxu0 %v1646_v0  ;;  %v1778_v0 = vld [vmem:[%s2633_s11 + $0x1] ss:$0 sm:$0xff] }
  0x34   :  { %464 = vmatpush.msrb.mxu0 %v1645_v4  ;;  %v1657_v4 = vld [vmem:[%s2672_s9 + $0x20] sm:$0xff] }
  0x36   :  { %465 = vmatpush.msrb.mxu0 %v1644_v8 }
  0x38   :  { %466 = vmatpush.msrb.mxu0 %v1643_v12 }
  0x9f   :  { %v151_v29 = vpop.f32.mrf.mxu1 }
  0xae   :  { %v131_v28 = vpop.f32.mrf.mxu0 }
  0xaf   :  { %v132_v30 = vadd.f32 %v1771_v26, %v131_v28 }
  0xb1   :  { %v152_v33 = vadd.f32 %v151_v29, %v132_v30 }
  0xb3   :  { %v158_v34 = vadd.f32 %v156_v31, %v152_v33  ;;  %v161_v35 = vadd.f32 %v159_v32, %v152_v33  ;;  %v1772_v31 = vld [vmem:[%s2673_s6] ss:$0 sm:$0xff] }
  0xb5   :  { %v163_v37 = vrot.slane %v158_v34, 7  ;;  %v2081_v38 = vrot.slane %v161_v35, 6  ;;  %v1773_v34 = vld [vmem:[%s2674_s1] ss:$0 sm:$0xff] }
  0xb7   :  { %v171_v39 = vsel %vm170_vm1, %v154_v27, %v163_v37  ;;  %v185_v43 = vsel %vm184_vm5, %v2081_v38, 0.0 }
  0xb8   :  { %v173_v40 = vsel %vm172_vm2, %v171_v39, %v165_v36  ;;  %vm386_vm2 = vcmask 74752  }
  0xb9   :  { %v2085_v41 = vsel %vm174_vm3, %v173_v40, %v2081_v38 }
  0xba   :  { %v181_v42 = vsel %vm180_vm4, %v2085_v41, 0.0 }
  0xbb   :  { %182 = vadd.xlane.f32.xlu0 %v181_v42 }
  0xc3   :  { %186 = vadd.xlane.f32.xlu0 %v185_v43 }
 0x12e   :  { %v183_v51 = vpop.xlane.xlu0 %182 }
 0x12f   :  { %v195_v52 = vmul.f32 %v2091_v50, %v183_v51 }
 0x131   :  { %v2095_v53 = vsub.f32 %v2085_v41, %v195_v52 }
 0x133   :  { %v199_v54 = vmul.f32 %v2095_v53, %v2095_v53 }
 0x135   :  { %v201_v55 = vsel %vm180_vm4, %v199_v54, 0.0  ;;  %v1777_v54 = vld [vmem:[%s2633_s11] ss:$0 sm:$0xff] }
 0x136   :  { %202 = vadd.xlane.f32.xlu1 %v201_v55  ;;  %v187_v56 = vpop.xlane.xlu0 %186 }
 0x137   :  { %v196_v57 = vmul.f32 %v2091_v50, %v187_v56 }
 0x139   :  { %v2102_v58 = vsub.f32 %v2081_v38, %v196_v57 }
 0x13b   :  { %v200_v59 = vmul.f32 %v2102_v58, %v2102_v58 }
 0x13d   :  { %v204_v60 = vsel %vm184_vm5, %v200_v59, 0.0  ;;  %v1776_v59 = vld [vmem:[%s2632_s10] ss:$0 sm:$0xff] }
 0x13e   :  { %205 = vadd.xlane.f32.xlu1 %v204_v60 }
 0x1a9   :  { %v203_v13 = vpop.xlane.xlu1 %202 }
 0x1aa   :  { %v207_v14 = vmul.f32 %v203_v13, %v2091_v50 }
 0x1ac   :  { %v209_v15 = vadd.f32 1e-06, %v207_v14  ;;  %v2230_v14 = vld [vmem:[%s2634_s4 + $0x8] sm:$0x3] }
 0x1ae   :  { %1803 = vrsqrt.f32 %v209_v15  ;;  %vm217_vm8 = vweird.f32 %v209_v15 }
 0x1b1   :  { %v206_v18 = vpop.xlane.xlu1 %205 }
 0x1b2   :  { %v208_v20 = vmul.f32 %v206_v18, %v2091_v50 }
 0x1b4   :  { %v1804_v22 = vpop.eup %1803  ;;  %v210_v23 = vadd.f32 1e-06, %v208_v20 }
 0x1b5   :  { %v212_v24 = vmul.f32 %v1804_v22, %v209_v15  ;;  %vm218_vm7 = vweird.f32 %v1804_v22 }
 0x1b6   :  { %1805 = vrsqrt.f32 %v210_v23  ;;  %vm219_vm9 = vmor %vm217_vm8, %vm218_vm7  ;;  %vm227_vm11 = vweird.f32 %v210_v23 }
 0x1b7   :  { %v213_v25 = vmul.f32 %v1804_v22, %v212_v24 }
 0x1b9   :  { %v214_v26 = vmul.f32 0.5, %v213_v25 }
 0x1bb   :  { %v215_v27 = vsub.f32 1.5, %v214_v26 }
 0x1bc   :  { %v1806_v28 = vpop.eup %1805 }
 0x1bd   :  { %v216_v29 = vmul.f32 %v1804_v22, %v215_v27  ;;  %v222_v30 = vmul.f32 %v1806_v28, %v210_v23  ;;  %vm228_vm10 = vweird.f32 %v1806_v28 }
 0x1be   :  { %vm229_vm12 = vmor %vm227_vm11, %vm228_vm10 }
 0x1bf   :  { %v220_v32 = vsel %vm219_vm9, %v1804_v22, %v216_v29  ;;  %v223_v33 = vmul.f32 %v1806_v28, %v222_v30 }
 0x1c0   :  { %v231_v35 = vmul.f32 %v220_v32, %v2095_v53 }
 0x1c1   :  { %v224_v36 = vmul.f32 0.5, %v223_v33 }
 0x1c2   :  { %v236_v37 = vmul.f32 %v1772_v31, %v231_v35 }
 0x1c3   :  { %v225_v39 = vsub.f32 1.5, %v224_v36 }
 0x1c4   :  { %v241_v40 = vadd.f32 %v1773_v34, %v236_v37 }
 0x1c5   :  { %v226_v42 = vmul.f32 %v1806_v28, %v225_v39 }
 0x1c6   :  { %1630 = vmatmul.msk.f32.vlgmr.msra.gmra.mxu2 %vm180_vm4, %v241_v40  ;;  %1632 = vmatmul.msk.f32.vlgmr.msra.gmra.mxu3 %vm180_vm4, %v241_v40 }
 0x1c7   :  { %v230_v43 = vsel %vm229_vm12, %v1806_v28, %v226_v42  ;;  %1634 = vmatmul.msk.f32.vlgmr.msrb.gmra.mxu1 %vm180_vm4, %v241_v40  ;;  %1648 = vmatmul.msk.f32.vlgmr.msrb.gmra.mxu0 %vm180_vm4, %v241_v40 }
 0x1c8   :  { %v232_v44 = vmul.f32 %v230_v43, %v2102_v58  ;;  %v1775_v43 = vld [vmem:[%s2632_s10 + $0x1] ss:$0 sm:$0xff] }
 0x1ca   :  { %v237_v45 = vmul.f32 %v1772_v31, %v232_v44 }
 0x1cc   :  { %v242_v46 = vadd.f32 %v1773_v34, %v237_v45  ;;  %v440_v34 = vld [vmem:[%s2635_s13 + $0x8] sm:$0xff] }
 0x1ce   :  { %1631 = vmatmul.msk.f32.gmra.mxu2 %vm180_vm4, %v242_v46  ;;  %1633 = vmatmul.msk.f32.gmra.mxu3 %vm180_vm4, %v242_v46 }
 0x1cf   :  { %1635 = vmatmul.msk.f32.gmra.mxu1 %vm180_vm4, %v242_v46  ;;  %1649 = vmatmul.msk.f32.gmra.mxu0 %vm180_vm4, %v242_v46 }
 0x1d7   :  { %1655 = vmatmul.msk.f32.vlgmr.msra.gmra.mxu1 %vm180_vm4, %v241_v40 }
 0x1df   :  { %1656 = vmatmul.msk.f32.gmra.mxu1 %vm180_vm4, %v242_v46 }
 0x244   :  { %v336_v47 = vpop.f32.mrf.mxu1  ;;  %v468_v42 = vpop.f32.mrf.mxu0 }
 0x245   :  { %v337_v53 = vadd.f32 %v1774_v49, %v336_v47  ;;  %v469_v44 = vadd.f32 %v1775_v43, %v468_v42  ;;  %v439_v47 = vld [vmem:[%s2635_s13] sm:$0xff]  ;;  %v759_v42 = vld [vmem:[%s2640_s17 + $0x8] sm:$0xff] }
 0x249   :  { %v305_v48 = vpop.f32.mrf.mxu3  ;;  %v274_v57 = vpop.f32.mrf.mxu2 }
 0x24a   :  { %v306_v60 = vadd.f32 %v1777_v54, %v305_v48  ;;  %v275_v62 = vadd.f32 %v1776_v59, %v274_v57 }
 0x24c   :  { %v339_v51 = vpop.f32.mrf.mxu1  ;;  %v471_v45 = vpop.f32.mrf.mxu0 }
 0x24d   :  { %v340_v52 = vadd.f32 %v1774_v49, %v339_v51 }
 0x24f   :  { %1640 = vmatpush.msk.msrb.mxu3 %vm412_vm13, %v340_v52 }
 0x251   :  { %431 = vmatpush.msrb.mxu3 %v337_v53  ;;  %v308_v55 = vpop.f32.mrf.mxu3  ;;  %v277_v5 = vpop.f32.mrf.mxu2 }
 0x252   :  { %v309_v56 = vadd.f32 %v1777_v54, %v308_v55  ;;  %v278_v6 = vadd.f32 %v1776_v59, %v277_v5  ;;  %v1672_v5 = vld [vmem:[%s2635_s13 + $0x18] sm:$0xff] }
 0x253   :  { %656 = vmatpush.msrb.mxu1 %v1672_v5 }
 0x254   :  { %v501_v58 = vpop.f32.mrf.mxu1  ;;  %1636 = vmatpush.xpose.msk.msrb.mxu2 %vm342_vm14, %v309_v56 }
 0x255   :  { %v502_v7 = vadd.f32 %v1778_v0, %v501_v58 }
 0x258   :  { %1637 = vmatpush.xpose.msk.msrb.mxu2 %vm342_vm14, %v306_v60 }
 0x25b   :  { %1638 = vmatmul.msk.f32.vlgmr.msrb.gmra.mxu2 %vm342_vm14, %v275_v62 }
 0x25c   :  { %529 = vmatpush.msra.mxu2 %v1660_v61  ;;  %v504_v2 = vpop.f32.mrf.mxu1 }
 0x25d   :  { %v505_v3 = vadd.f32 %v1778_v0, %v504_v2 }
 0x25e   :  { %530 = vmatpush.msra.mxu2 %v1659_v63 }
 0x25f   :  { %1664 = vmatpush.xpose.msk.msra.mxu3 %vm342_vm14, %v505_v3 }
 0x260   :  { %531 = vmatpush.msra.mxu2 %v1658_v1 }
 0x262   :  { %532 = vmatpush.msra.mxu2 %v1657_v4 }
 0x263   :  { %1665 = vmatpush.xpose.msk.msra.mxu3 %vm342_vm14, %v502_v7  ;;  %1639 = vmatmul.msk.f32.gmra.mxu2 %vm342_vm14, %v278_v6 }
 0x264   :  { %685 = vmatpush.msrb.mxu2 %v440_v34 }
 0x266   :  { %686 = vmatpush.msrb.mxu2 %v439_v47 }
 0x26b   :  { %1662 = vmatmul.msk.f32.vlgmr.msra.gmra.mxu2 %vm180_vm4, %v241_v40 }
 0x273   :  { %1663 = vmatmul.msk.f32.gmra.mxu2 %vm180_vm4, %v242_v46  ;;  %v472_v46 = vadd.f32 %v1775_v43, %v471_v45  ;;  %v758_v43 = vld [vmem:[%s2640_s17] sm:$0xff] }
 0x2de   :  { %v372_v8 = vpop.f32.mrf.mxu2 }
 0x2df   :  { %v378_v10 = vmul.f32 0.25, %v372_v8 }
 0x2e1   :  { %v380_v11 = vadd.f32 %v378_v10, %v2223_v9 }
 0x2e3   :  { %v383_v12 = vsel %vm382_vm15, %v380_v11, -inf }
 0x2e4   :  { %384 = vmax.xlane.f32.xlu2 %v383_v12 }
 0x2e6   :  { %v375_v13 = vpop.f32.mrf.mxu2 }
 0x2e7   :  { %v379_v15 = vmul.f32 0.25, %v375_v13  ;;  %v1671_v13 = vld [vmem:[%s2635_s13 + $0x10] sm:$0xff] }
 0x2e8   :  { %657 = vmatpush.msrb.mxu1 %v1671_v13  ;;  %v817_v13 = vld [vmem:[%s2642_s19 + $0x20] sm:$0xff] }
 0x2e9   :  { %v381_v16 = vadd.f32 %v379_v15, %v2230_v14 }
 0x2eb   :  { %v387_v17 = vsel %vm386_vm2, %v381_v16, -inf }
 0x2ec   :  { %388 = vmax.xlane.f32.xlu2 %v387_v17 }
 0x2ee   :  { %v534_v18 = vpop.f32.mrf.mxu2 }
 0x2ef   :  { %v535_v22 = vadd.f32 %v1779_v19, %v534_v18 }
 0x2f6   :  { %v537_v20 = vpop.f32.mrf.mxu2 }
 0x2f7   :  { %v538_v21 = vadd.f32 %v1779_v19, %v537_v20  ;;  %v1780_v20 = vld [vmem:[%s2636_s14] ss:$0 sm:$0xff] }
 0x2f9   :  { %1668 = vmatpush.msk.msra.mxu0 %vm412_vm13, %v538_v21 }
 0x2fb   :  { %625 = vmatpush.msra.mxu0 %v535_v22 }
 0x357   :  { %v385_v23 = vpop.xlane.xlu2 %384 }
 0x358   :  { %v390_v24 = vsub.f32 %v380_v11, %v385_v23 }
 0x35a   :  { %v392_v25 = vmul.f32 1.442695, %v390_v24 }
 0x35c   :  { %1807 = vpow2.f32 %v392_v25 }
 0x35f   :  { %v389_v26 = vpop.xlane.xlu2 %388 }
 0x360   :  { %v391_v27 = vsub.f32 %v381_v16, %v389_v26 }
 0x362   :  { %v1808_v28 = vpop.eup %1807  ;;  %v394_v29 = vmul.f32 1.442695, %v391_v27 }
 0x363   :  { %v396_v30 = vsel %vm382_vm15, %v1808_v28, 0.0 }
 0x364   :  { %1809 = vpow2.f32 %v394_v29  ;;  %397 = vadd.xlane.f32.xlu0 %v396_v30 }
 0x36a   :  { %v1810_v31 = vpop.eup %1809 }
 0x36b   :  { %v399_v32 = vsel %vm386_vm2, %v1810_v31, 0.0 }
 0x36c   :  { %400 = vadd.xlane.f32.xlu1 %v399_v32 }
 0x3d7   :  { %v398_v33 = vpop.xlane.xlu0 %397 }
 0x3d8   :  { %1811 = vrcp.f32 %v398_v33 }
 0x3de   :  { %v1812_v35 = vpop.eup %1811 }
 0x3df   :  { %v401_v36 = vpop.xlane.xlu1 %400  ;;  %v404_v37 = vmul.f32 %v1812_v35, %v1808_v28 }
 0x3e0   :  { %1813 = vrcp.f32 %v401_v36 }
 0x3e1   :  { %1641 = vmatmul.msk.f32.vlgmr.msrb.gmra.mxu3 %vm382_vm15, %v404_v37 }
 0x3e6   :  { %v1814_v39 = vpop.eup %1813 }
 0x3e7   :  { %v405_v40 = vmul.f32 %v1814_v39, %v1810_v31  ;;  %v761_v39 = vld [vmem:[%s2640_s17 + $0x18] sm:$0xff] }
 0x3e8   :  { %784 = vmatpush.msrb.mxu3 %v761_v39 }
 0x3e9   :  { %1642 = vmatmul.msk.f32.gmra.mxu3 %vm382_vm15, %v405_v40  ;;  %v760_v40 = vld [vmem:[%s2640_s17 + $0x10] sm:$0xff] }
 0x3ea   :  { %785 = vmatpush.msrb.mxu3 %v760_v40 }
 0x3ec   :  { %786 = vmatpush.msrb.mxu3 %v759_v42 }
 0x3ee   :  { %787 = vmatpush.msrb.mxu3 %v758_v43 }
 0x3f1   :  { %1666 = vmatmul.msk.f32.vlgmr.msra.gmra.mxu3 %vm342_vm14, %v469_v44 }
 0x3f9   :  { %1667 = vmatmul.msk.f32.gmra.mxu3 %vm342_vm14, %v472_v46 }
 0x464   :  { %v433_v48 = vpop.f32.mrf.mxu3 }
 0x465   :  { %1675 = vmatmul.msk.f32.vlgmr.msrb.gmra.mxu2 %vm342_vm14, %v433_v48 }
 0x46c   :  { %v436_v49 = vpop.f32.mrf.mxu3 }
 0x46d   :  { %1676 = vmatmul.msk.f32.gmra.mxu2 %vm342_vm14, %v436_v49 }
 0x474   :  { %v569_v51 = vpop.f32.mrf.mxu3 }
 0x475   :  { %v575_v52 = vmul.f32 0.25, %v569_v51 }
 0x477   :  { %v577_v53 = vadd.f32 %v575_v52, %v2223_v9 }
 0x479   :  { %v579_v54 = vsel %vm382_vm15, %v577_v53, -inf }
 0x47a   :  { %580 = vmax.xlane.f32.xlu2 %v579_v54 }
 0x47c   :  { %v572_v55 = vpop.f32.mrf.mxu3 }
 0x47d   :  { %v576_v56 = vmul.f32 0.25, %v572_v55 }
 0x47f   :  { %v578_v57 = vadd.f32 %v576_v56, %v2230_v14 }
 0x481   :  { %v582_v58 = vsel %vm386_vm2, %v578_v57, -inf }
 0x482   :  { %583 = vmax.xlane.f32.xlu0 %v582_v58 }
 0x4e8   :  { %v688_v17 = vpop.f32.mrf.mxu2 }
 0x4ed   :  { %v581_v59 = vpop.xlane.xlu2 %580 }
 0x4ee   :  { %v585_v60 = vsub.f32 %v577_v53, %v581_v59  ;;  %v1781_v59 = vld [vmem:[%s2637_s15] ss:$0 sm:$0xff] }
 0x4f0   :  { %v587_v61 = vmul.f32 1.442695, %v585_v60  ;;  %v691_v24 = vpop.f32.mrf.mxu2 }
 0x4f2   :  { %1815 = vpow2.f32 %v587_v61 }
 0x4f5   :  { %v584_v62 = vpop.xlane.xlu0 %583 }
 0x4f6   :  { %v586_v63 = vsub.f32 %v578_v57, %v584_v62 }
 0x4f8   :  { %v1816_v0 = vpop.eup %1815  ;;  %v589_v1 = vmul.f32 1.442695, %v586_v63  ;;  %v1782_v63 = vld [vmem:[%s2638_s16] ss:$0 sm:$0xff] }
 0x4f9   :  { %v591_v2 = vsel %vm382_vm15, %v1816_v0, 0.0 }
 0x4fa   :  { %1817 = vpow2.f32 %v589_v1  ;;  %592 = vadd.xlane.f32.xlu1 %v591_v2 }
 0x500   :  { %v1818_v3 = vpop.eup %1817 }
 0x501   :  { %v594_v4 = vsel %vm386_vm2, %v1818_v3, 0.0 }
 0x502   :  { %595 = vadd.xlane.f32.xlu2 %v594_v4 }
 0x56d   :  { %v593_v6 = vpop.xlane.xlu1 %592 }
 0x56e   :  { %1819 = vrcp.f32 %v593_v6 }
 0x574   :  { %v1820_v7 = vpop.eup %1819 }
 0x575   :  { %v599_v8 = vmul.f32 %v1820_v7, %v1816_v0  ;;  %v596_v10 = vpop.xlane.xlu2 %595 }
 0x576   :  { %1821 = vrcp.f32 %v596_v10  ;;  %v820_v10 = vld [vmem:[%s2642_s19 + $0x38] sm:$0xff] }
 0x577   :  { %1669 = vmatmul.msk.f32.vlgmr.msra.gmra.mxu0 %vm382_vm15, %v599_v8 }
 0x578   :  { %835 = vmatpush.msrb.mxu0 %v820_v10  ;;  %v1697_v10 = vld [vmem:[%s2672_s9 + $0x40] sm:$0xff] }
 0x57c   :  { %v1822_v11 = vpop.eup %1821 }
 0x57d   :  { %v600_v12 = vmul.f32 %v1822_v11, %v1818_v3  ;;  %v819_v11 = vld [vmem:[%s2642_s19 + $0x30] sm:$0xff] }
 0x57e   :  { %836 = vmatpush.msrb.mxu0 %v819_v11 }
 0x57f   :  { %1670 = vmatmul.msk.f32.gmra.mxu0 %vm382_vm15, %v600_v12  ;;  %v818_v12 = vld [vmem:[%s2642_s19 + $0x28] sm:$0xff] }
 0x580   :  { %837 = vmatpush.msrb.mxu0 %v818_v12 }
 0x582   :  { %838 = vmatpush.msrb.mxu0 %v817_v13 }
 0x5f4   :  { %v627_v15 = vpop.f32.mrf.mxu0 }
 0x5f5   :  { %1673 = vmatmul.msk.f32.vlgmr.msrb.gmra.mxu1 %vm342_vm14, %v627_v15  ;;  %v816_v15 = vld [vmem:[%s2642_s19 + $0x18] sm:$0xff] }
 0x5f6   :  { %839 = vmatpush.msrb.mxu0 %v816_v15  ;;  %v1716_v15 = vld [vmem:[%s2670_s3 + $0x78] sm:$0xff] }
 0x5fc   :  { %v630_v16 = vpop.f32.mrf.mxu0 }
 0x5fd   :  { %1674 = vmatmul.msk.f32.gmra.mxu1 %vm342_vm14, %v630_v16  ;;  %v815_v16 = vld [vmem:[%s2642_s19 + $0x10] sm:$0xff] }
 0x5fe   :  { %840 = vmatpush.msrb.mxu0 %v815_v16  ;;  %v1723_v16 = vld [vmem:[%s2671_s8 + $0x78] sm:$0xff] }
 0x672   :  { %v659_v18 = vpop.f32.mrf.mxu1 }
 0x673   :  { %v689_v19 = vadd.f32 %v688_v17, %v659_v18  ;;  %v814_v17 = vld [vmem:[%s2642_s19 + $0x8] sm:$0xff]  ;;  %v813_v18 = vld [vmem:[%s2642_s19] sm:$0xff] }
 0x674   :  { %841 = vmatpush.msrb.mxu0 %v814_v17  ;;  %v1715_v17 = vld [vmem:[%s2670_s3 + $0x70] sm:$0xff] }
 0x675   :  { %v694_v21 = vadd.f32 %v689_v19, %v2085_v41  ;;  %v1783_v19 = vld [vmem:[%s2639_s18] ss:$0 sm:$0xff] }
 0x676   :  { %842 = vmatpush.msrb.mxu0 %v813_v18  ;;  %v1722_v18 = vld [vmem:[%s2671_s8 + $0x70] sm:$0xff] }
 0x677   :  { %v2275_v22 = vadd.f32 %v1780_v20, %v694_v21 }
 0x679   :  { %v704_v23 = vsel %vm180_vm4, %v2275_v22, 0.0 }
 0x67a   :  { %705 = vadd.xlane.f32.xlu0 %v704_v23  ;;  %v662_v25 = vpop.f32.mrf.mxu1 }
 0x67b   :  { %v692_v26 = vadd.f32 %v691_v24, %v662_v25 }
 0x67d   :  { %v695_v27 = vadd.f32 %v692_v26, %v2081_v38 }
 0x67f   :  { %v2280_v28 = vadd.f32 %v1780_v20, %v695_v27 }
 0x681   :  { %v707_v29 = vsel %vm184_vm5, %v2280_v28, 0.0 }
 0x682   :  { %708 = vadd.xlane.f32.xlu1 %v707_v29 }
 0x6ed   :  { %v706_v30 = vpop.xlane.xlu0 %705 }
 0x6ee   :  { %v710_v41 = vmul.f32 %v706_v30, %v2091_v50 }
 0x6f0   :  { %v712_v31 = vsub.f32 %v2275_v22, %v710_v41 }
 0x6f2   :  { %v714_v32 = vmul.f32 %v712_v31, %v712_v31 }
 0x6f4   :  { %v716_v33 = vsel %vm180_vm4, %v714_v32, 0.0 }
 0x6f5   :  { %v709_v34 = vpop.xlane.xlu1 %708  ;;  %717 = vadd.xlane.f32.xlu2 %v716_v33 }
 0x6f6   :  { %v711_v35 = vmul.f32 %v709_v34, %v2091_v50 }
 0x6f8   :  { %v713_v38 = vsub.f32 %v2280_v28, %v711_v35 }
 0x6fa   :  { %v715_v36 = vmul.f32 %v713_v38, %v713_v38 }
 0x6fc   :  { %v719_v37 = vsel %vm184_vm5, %v715_v36, 0.0 }
 0x6fd   :  { %720 = vadd.xlane.f32.xlu0 %v719_v37 }
 0x768   :  { %v718_v44 = vpop.xlane.xlu2 %717 }
 0x769   :  { %v722_v45 = vmul.f32 %v718_v44, %v2091_v50  ;;  %v1784_v44 = vld [vmem:[%s2641_s20] ss:$0 sm:$0xff] }
 0x76b   :  { %v724_v46 = vadd.f32 1e-06, %v722_v45 }
 0x76d   :  { %1823 = vrsqrt.f32 %v724_v46  ;;  %vm732_vm6 = vweird.f32 %v724_v46 }
 0x770   :  { %v721_v47 = vpop.xlane.xlu0 %720 }
 0x771   :  { %v723_v48 = vmul.f32 %v721_v47, %v2091_v50 }
 0x773   :  { %v1824_v49 = vpop.eup %1823  ;;  %v725_v51 = vadd.f32 1e-06, %v723_v48 }
 0x774   :  { %v727_v52 = vmul.f32 %v1824_v49, %v724_v46  ;;  %vm733_vm3 = vweird.f32 %v1824_v49 }
 0x775   :  { %1825 = vrsqrt.f32 %v725_v51  ;;  %vm734_vm7 = vmor %vm732_vm6, %vm733_vm3  ;;  %vm742_vm9 = vweird.f32 %v725_v51 }
 0x776   :  { %v728_v53 = vmul.f32 %v1824_v49, %v727_v52 }
 0x778   :  { %v729_v54 = vmul.f32 0.5, %v728_v53 }
 0x77a   :  { %v730_v55 = vsub.f32 1.5, %v729_v54 }
 0x77b   :  { %v1826_v56 = vpop.eup %1825 }
 0x77c   :  { %v731_v57 = vmul.f32 %v1824_v49, %v730_v55  ;;  %v737_v58 = vmul.f32 %v1826_v56, %v725_v51  ;;  %vm743_vm8 = vweird.f32 %v1826_v56 }
 0x77d   :  { %vm744_vm10 = vmor %vm742_vm9, %vm743_vm8 }
 0x77e   :  { %v735_v60 = vsel %vm734_vm7, %v1824_v49, %v731_v57  ;;  %v738_v61 = vmul.f32 %v1826_v56, %v737_v58 }
 0x77f   :  { %v746_v62 = vmul.f32 %v735_v60, %v712_v31 }
 0x780   :  { %v739_v0 = vmul.f32 0.5, %v738_v61 }
 0x781   :  { %v751_v1 = vmul.f32 %v1781_v59, %v746_v62  ;;  %v1686_v62 = vld [vmem:[%s2670_s3 + $0x58] sm:$0xff] }
 0x782   :  { %v740_v2 = vsub.f32 1.5, %v739_v0  ;;  %v1700_v0 = vld [vmem:[%s2672_s9 + $0x58] sm:$0xff]  ;;  %944 = vmatpush.msra.mxu1 %v1686_v62 }
 0x783   :  { %v756_v3 = vadd.f32 %v1782_v63, %v751_v1  ;;  %1010 = vmatpush.msra.mxu3 %v1700_v0  ;;  %v1685_v1 = vld [vmem:[%s2670_s3 + $0x50] sm:$0xff] }
 0x784   :  { %v741_v4 = vmul.f32 %v1826_v56, %v740_v2  ;;  %v1692_v2 = vld [vmem:[%s2671_s8 + $0x50] sm:$0xff]  ;;  %945 = vmatpush.msra.mxu1 %v1685_v1 }
 0x785   :  { %1677 = vmatmul.msk.f32.vlgmr.msrb.gmra.mxu3 %vm180_vm4, %v756_v3  ;;  %v1699_v3 = vld [vmem:[%s2672_s9 + $0x50] sm:$0xff] }
 0x786   :  { %v745_v5 = vsel %vm744_vm10, %v1826_v56, %v741_v4  ;;  %1011 = vmatpush.msra.mxu3 %v1699_v3  ;;  %v1684_v4 = vld [vmem:[%s2670_s3 + $0x48] sm:$0xff]  ;;  %v1729_v1 = vld [vmem:[%s2672_s9 + $0x70] sm:$0xff] }
 0x787   :  { %v747_v6 = vmul.f32 %v745_v5, %v713_v38  ;;  %v1691_v5 = vld [vmem:[%s2671_s8 + $0x48] sm:$0xff]  ;;  %946 = vmatpush.msra.mxu1 %v1684_v4  ;;  %v1727_v4 = vld [vmem:[%s2672_s9 + $0x60] sm:$0xff] }
 0x788   :  { %v1728_v3 = vld [vmem:[%s2672_s9 + $0x68] sm:$0xff] }
 0x789   :  { %v752_v7 = vmul.f32 %v1781_v59, %v747_v6  ;;  %v1698_v6 = vld [vmem:[%s2672_s9 + $0x48] sm:$0xff] }
 0x78a   :  { %1012 = vmatpush.msra.mxu3 %v1698_v6 }
 0x78b   :  { %v757_v8 = vadd.f32 %v1782_v63, %v752_v7  ;;  %v1693_v63 = vld [vmem:[%s2671_s8 + $0x58] sm:$0xff]  ;;  %v1683_v7 = vld [vmem:[%s2670_s3 + $0x40] sm:$0xff] }
 0x78c   :  { %977 = vmatpush.msra.mxu2 %v1693_v63  ;;  %947 = vmatpush.msra.mxu1 %v1683_v7  ;;  %v1730_v63 = vld [vmem:[%s2672_s9 + $0x78] sm:$0xff]  ;;  %v1791_v7 = vld [vmem:[%s2633_s11 + $0x3] ss:$0 sm:$0xff] }
 0x78d   :  { %1678 = vmatmul.msk.f32.gmra.mxu3 %vm180_vm4, %v757_v8  ;;  %v1690_v8 = vld [vmem:[%s2671_s8 + $0x40] sm:$0xff] }
 0x78e   :  { %978 = vmatpush.msra.mxu2 %v1692_v2  ;;  %1013 = vmatpush.msra.mxu3 %v1697_v10 }
 0x790   :  { %979 = vmatpush.msra.mxu2 %v1691_v5  ;;  %1172 = vmatpush.msrb.mxu3 %v1723_v16 }
 0x792   :  { %980 = vmatpush.msra.mxu2 %v1690_v8  ;;  %1173 = vmatpush.msrb.mxu3 %v1722_v18 }
 0x794   :  { %1139 = vmatpush.msrb.mxu2 %v1716_v15 }
 0x796   :  { %1140 = vmatpush.msrb.mxu2 %v1715_v17 }
 0x808   :  { %v789_v20 = vpop.f32.mrf.mxu3 }
 0x809   :  { %v790_v21 = vadd.f32 %v1783_v19, %v789_v20  ;;  %v1714_v20 = vld [vmem:[%s2670_s3 + $0x68] sm:$0xff] }
 0x80a   :  { %1141 = vmatpush.msrb.mxu2 %v1714_v20 }
 0x80b   :  { %v795_v23 = vmul.f32 %v790_v21, %v790_v21 }
 0x80d   :  { %v797_v24 = vmul.f32 %v795_v23, %v790_v21 }
 0x80f   :  { %v799_v25 = vmul.f32 0.044715, %v797_v24  ;;  %v1713_v24 = vld [vmem:[%s2670_s3 + $0x60] sm:$0xff] }
 0x810   :  { %v792_v26 = vpop.f32.mrf.mxu3  ;;  %1142 = vmatpush.msrb.mxu2 %v1713_v24 }
 0x811   :  { %v801_v27 = vadd.f32 %v799_v25, %v790_v21  ;;  %v793_v29 = vadd.f32 %v1783_v19, %v792_v26  ;;  %v1720_v25 = vld [vmem:[%s2671_s8 + $0x60] sm:$0xff] }
 0x813   :  { %v803_v30 = vmul.f32 0.7978846, %v801_v27  ;;  %v796_v41 = vmul.f32 %v793_v29, %v793_v29 }
 0x815   :  { %1827 = vtanh.f32 %v803_v30  ;;  %v798_v31 = vmul.f32 %v796_v41, %v793_v29 }
 0x817   :  { %v800_v32 = vmul.f32 0.044715, %v798_v31 }
 0x819   :  { %v802_v33 = vadd.f32 %v800_v32, %v793_v29 }
 0x81b   :  { %v1828_v34 = vpop.eup %1827  ;;  %v804_v35 = vmul.f32 0.7978846, %v802_v33 }
 0x81c   :  { %v807_v38 = vadd.f32 1.0, %v1828_v34 }
 0x81d   :  { %1829 = vtanh.f32 %v804_v35  ;;  %v1785_v35 = vld [vmem:[%s2673_s6 + $0x1] ss:$0 sm:$0xff] }
 0x81e   :  { %v809_v36 = vmul.f32 0.5, %v807_v38 }
 0x820   :  { %v811_v37 = vmul.f32 %v809_v36, %v790_v21  ;;  %v1721_v21 = vld [vmem:[%s2671_s8 + $0x68] sm:$0xff] }
 0x821   :  { %1174 = vmatpush.msrb.mxu3 %v1721_v21 }
 0x822   :  { %1679 = vmatmul.msk.f32.vlgmr.msrb.gmra.mxu0 %vm110_vm0, %v811_v37  ;;  %v1786_v37 = vld [vmem:[%s2674_s1 + $0x1] ss:$0 sm:$0xff] }
 0x823   :  { %v1830_v39 = vpop.eup %1829  ;;  %1175 = vmatpush.msrb.mxu3 %v1720_v25 }
 0x824   :  { %v808_v40 = vadd.f32 1.0, %v1830_v39 }
 0x826   :  { %v810_v42 = vmul.f32 0.5, %v808_v40 }
 0x828   :  { %v812_v43 = vmul.f32 %v810_v42, %v793_v29 }
 0x82a   :  { %1680 = vmatmul.msk.f32.gmra.mxu0 %vm110_vm0, %v812_v43 }
 0x89f   :  { %v844_v45 = vpop.f32.mrf.mxu0 }
 0x8a0   :  { %v850_v46 = vadd.f32 %v844_v45, %v2275_v22 }
 0x8a2   :  { %v2345_v47 = vadd.f32 %v1784_v44, %v850_v46 }
 0x8a4   :  { %v862_v48 = vsel %vm180_vm4, %v2345_v47, 0.0 }
 0x8a5   :  { %863 = vadd.xlane.f32.xlu1 %v862_v48 }
 0x8a7   :  { %v847_v49 = vpop.f32.mrf.mxu0 }
 0x8a8   :  { %v851_v51 = vadd.f32 %v847_v49, %v2280_v28 }
 0x8aa   :  { %v2350_v52 = vadd.f32 %v1784_v44, %v851_v51 }
 0x8ac   :  { %v865_v53 = vsel %vm184_vm5, %v2350_v52, 0.0 }
 0x8ad   :  { %866 = vadd.xlane.f32.xlu2 %v865_v53 }
 0x918   :  { %v864_v54 = vpop.xlane.xlu1 %863 }
 0x919   :  { %v868_v55 = vmul.f32 %v864_v54, %v2091_v50 }
 0x91b   :  { %v2356_v22 = vsub.f32 %v2345_v47, %v868_v55  ;;  %v1788_v55 = vld [vmem:[%s2633_s11 + $0x2] ss:$0 sm:$0xff] }
 0x91d   :  { %v872_v56 = vmul.f32 %v2356_v22, %v2356_v22 }
 0x91f   :  { %v874_v57 = vsel %vm180_vm4, %v872_v56, 0.0 }
 0x920   :  { %875 = vadd.xlane.f32.xlu0 %v874_v57  ;;  %v867_v58 = vpop.xlane.xlu2 %866 }
 0x921   :  { %v869_v28 = vmul.f32 %v867_v58, %v2091_v50 }
 0x923   :  { %v2363_v59 = vsub.f32 %v2350_v52, %v869_v28 }
 0x925   :  { %v873_v60 = vmul.f32 %v2363_v59, %v2363_v59 }
 0x927   :  { %v877_v61 = vsel %vm184_vm5, %v873_v60, 0.0  ;;  %v1787_v60 = vld [vmem:[%s2632_s10 + $0x2] ss:$0 sm:$0xff] }
 0x928   :  { %878 = vadd.xlane.f32.xlu1 %v877_v61 }
 0x993   :  { %v876_v11 = vpop.xlane.xlu0 %875 }
 0x994   :  { %v880_v12 = vmul.f32 %v876_v11, %v2091_v50 }
 0x996   :  { %v882_v13 = vadd.f32 1e-06, %v880_v12 }
 0x998   :  { %1831 = vrsqrt.f32 %v882_v13  ;;  %vm890_vm12 = vweird.f32 %v882_v13 }
 0x99b   :  { %v879_v19 = vpop.xlane.xlu1 %878 }
 0x99c   :  { %v881_v23 = vmul.f32 %v879_v19, %v2091_v50 }
 0x99e   :  { %v1832_v26 = vpop.eup %1831  ;;  %v883_v27 = vadd.f32 1e-06, %v881_v23  ;;  %v1792_v23 = vld [vmem:[%s2675_s12 + $0x3] ss:$0 sm:$0xff] }
 0x99f   :  { %v885_v29 = vmul.f32 %v1832_v26, %v882_v13  ;;  %vm891_vm11 = vweird.f32 %v1832_v26 }
 0x9a0   :  { %1833 = vrsqrt.f32 %v883_v27  ;;  %vm892_vm3 = vmor %vm890_vm12, %vm891_vm11  ;;  %vm900_vm7 = vweird.f32 %v883_v27 }
 0x9a1   :  { %v886_v30 = vmul.f32 %v1832_v26, %v885_v29 }
 0x9a3   :  { %v887_v41 = vmul.f32 0.5, %v886_v30 }
 0x9a5   :  { %v888_v31 = vsub.f32 1.5, %v887_v41 }
 0x9a6   :  { %v1834_v32 = vpop.eup %1833 }
 0x9a7   :  { %v889_v33 = vmul.f32 %v1832_v26, %v888_v31  ;;  %v895_v34 = vmul.f32 %v1834_v32, %v883_v27  ;;  %vm901_vm6 = vweird.f32 %v1834_v32 }
 0x9a8   :  { %vm902_vm8 = vmor %vm900_vm7, %vm901_vm6 }
 0x9a9   :  { %v893_v38 = vsel %vm892_vm3, %v1832_v26, %v889_v33  ;;  %v896_v36 = vmul.f32 %v1834_v32, %v895_v34 }
 0x9aa   :  { %v904_v39 = vmul.f32 %v893_v38, %v2356_v22  ;;  %v1789_v22 = vld [vmem:[%s2675_s12 + $0x2] ss:$0 sm:$0xff] }
 0x9ab   :  { %v897_v40 = vmul.f32 0.5, %v896_v36 }
 0x9ac   :  { %v909_v42 = vmul.f32 %v1785_v35, %v904_v39 }
 0x9ad   :  { %v898_v43 = vsub.f32 1.5, %v897_v40 }
 0x9ae   :  { %v914_v44 = vadd.f32 %v1786_v37, %v909_v42 }
 0x9af   :  { %v899_v45 = vmul.f32 %v1834_v32, %v898_v43 }
 0x9b0   :  { %1688 = vmatmul.msk.f32.vlgmr.msra.gmra.mxu1 %vm180_vm4, %v914_v44  ;;  %1695 = vmatmul.msk.f32.vlgmr.msra.gmra.mxu2 %vm180_vm4, %v914_v44 }
 0x9b1   :  { %v903_v46 = vsel %vm902_vm8, %v1834_v32, %v899_v45  ;;  %1702 = vmatmul.msk.f32.vlgmr.msra.gmra.mxu3 %vm180_vm4, %v914_v44 }
 0x9b2   :  { %v905_v48 = vmul.f32 %v903_v46, %v2363_v59  ;;  %v1790_v46 = vld [vmem:[%s2632_s10 + $0x3] ss:$0 sm:$0xff] }
 0x9b4   :  { %v910_v49 = vmul.f32 %v1785_v35, %v905_v48 }
 0x9b6   :  { %v915_v51 = vadd.f32 %v1786_v37, %v910_v49  ;;  %v1712_v37 = vld [vmem:[%s2635_s13 + $0x28] sm:$0xff] }
 0x9b8   :  { %1689 = vmatmul.msk.f32.gmra.mxu1 %vm180_vm4, %v915_v51  ;;  %1696 = vmatmul.msk.f32.gmra.mxu2 %vm180_vm4, %v915_v51 }
 0x9b9   :  { %1703 = vmatmul.msk.f32.gmra.mxu3 %vm180_vm4, %v915_v51 }
 0x9c0   :  { %1718 = vmatmul.msk.f32.vlgmr.msrb.gmra.mxu2 %vm180_vm4, %v914_v44 }
 0x9c1   :  { %1725 = vmatmul.msk.f32.vlgmr.msrb.gmra.mxu3 %vm180_vm4, %v914_v44 }
 0x9c8   :  { %1719 = vmatmul.msk.f32.gmra.mxu2 %vm180_vm4, %v915_v51 }
 0x9c9   :  { %1726 = vmatmul.msk.f32.gmra.mxu3 %vm180_vm4, %v915_v51 }
 0xa2d   :  { %v949_v59 = vpop.f32.mrf.mxu1 }
 0xa2e   :  { %v950_v0 = vadd.f32 %v1787_v60, %v949_v59 }
 0xa33   :  { %v982_v53 = vpop.f32.mrf.mxu2 }
 0xa34   :  { %v1015_v54 = vpop.f32.mrf.mxu3  ;;  %v983_v62 = vadd.f32 %v1788_v55, %v982_v53  ;;  %v1711_v53 = vld [vmem:[%s2635_s13 + $0x20] sm:$0xff] }
 0xa35   :  { %v1016_v61 = vadd.f32 %v1789_v22, %v1015_v54  ;;  %v952_v5 = vpop.f32.mrf.mxu1 }
 0xa36   :  { %v953_v6 = vadd.f32 %v1787_v60, %v952_v5 }
 0xa3b   :  { %v985_v56 = vpop.f32.mrf.mxu2 }
 0xa3c   :  { %v986_v57 = vadd.f32 %v1788_v55, %v985_v56  ;;  %v1018_v58 = vpop.f32.mrf.mxu3 }
 0xa3d   :  { %v1019_v28 = vadd.f32 %v1789_v22, %v1018_v58 }
 0xa3e   :  { %1704 = vmatpush.xpose.msk.msra.mxu0 %vm342_vm14, %v986_v57 }
 0xa3f   :  { %1708 = vmatpush.msk.msrb.mxu1 %vm412_vm13, %v1019_v28 }
 0xa41   :  { %1106 = vmatpush.msrb.mxu1 %v1016_v61 }
 0xa42   :  { %1705 = vmatpush.xpose.msk.msra.mxu0 %vm342_vm14, %v983_v62 }
 0xa43   :  { %v1144_v45 = vpop.f32.mrf.mxu2 }
 0xa44   :  { %v1177_v2 = vpop.f32.mrf.mxu3  ;;  %v1145_v48 = vadd.f32 %v1790_v46, %v1144_v45 }
 0xa45   :  { %1706 = vmatmul.msk.f32.vlgmr.msra.gmra.mxu0 %vm342_vm14, %v950_v0  ;;  %v1178_v11 = vadd.f32 %v1791_v7, %v1177_v2 }
 0xa46   :  { %1205 = vmatpush.msrb.mxu0 %v1730_v63 }
 0xa48   :  { %1206 = vmatpush.msrb.mxu0 %v1729_v1 }
 0xa4a   :  { %1207 = vmatpush.msrb.mxu0 %v1728_v3 }
 0xa4b   :  { %v1147_v49 = vpop.f32.mrf.mxu2 }
 0xa4c   :  { %1208 = vmatpush.msrb.mxu0 %v1727_v4  ;;  %v1180_v8 = vpop.f32.mrf.mxu3 }
 0xa4d   :  { %v1181_v10 = vadd.f32 %v1791_v7, %v1180_v8  ;;  %1707 = vmatmul.msk.f32.gmra.mxu0 %vm342_vm14, %v953_v6 }
 0xa4e   :  { %1361 = vmatpush.msra.mxu0 %v1712_v37 }
 0xa4f   :  { %1734 = vmatpush.xpose.msk.msra.mxu1 %vm342_vm14, %v1181_v10 }
 0xa50   :  { %1362 = vmatpush.msra.mxu0 %v1711_v53 }
 0xa53   :  { %1735 = vmatpush.xpose.msk.msra.mxu1 %vm342_vm14, %v1178_v11 }
 0xa55   :  { %1732 = vmatmul.msk.f32.vlgmr.msrb.gmra.mxu0 %vm180_vm4, %v914_v44 }
 0xa5d   :  { %1733 = vmatmul.msk.f32.gmra.mxu0 %vm180_vm4, %v915_v51  ;;  %v1148_v51 = vadd.f32 %v1790_v46, %v1147_v49 }
 0xac2   :  { %v1050_v12 = vpop.f32.mrf.mxu0 }
 0xac3   :  { %v1056_v13 = vmul.f32 0.25, %v1050_v12 }
 0xac5   :  { %v1058_v15 = vadd.f32 %v1056_v13, %v2223_v9 }
 0xac7   :  { %v1060_v16 = vsel %vm382_vm15, %v1058_v15, -inf }
 0xac8   :  { %1061 = vmax.xlane.f32.xlu2 %v1060_v16 }
 0xaca   :  { %v1053_v17 = vpop.f32.mrf.mxu0 }
 0xacb   :  { %v1057_v18 = vmul.f32 0.25, %v1053_v17 }
 0xacd   :  { %v1059_v19 = vadd.f32 %v1057_v18, %v2230_v14 }
 0xacf   :  { %v1063_v20 = vsel %vm386_vm2, %v1059_v19, -inf }
 0xad0   :  { %1064 = vmax.xlane.f32.xlu0 %v1063_v20 }
 0xad2   :  { %v1210_v21 = vpop.f32.mrf.mxu0 }
 0xad3   :  { %v1211_v26 = vadd.f32 %v1792_v23, %v1210_v21  ;;  %v1793_v21 = vld [vmem:[%s2636_s14 + $0x1] ss:$0 sm:$0xff] }
 0xada   :  { %v1213_v24 = vpop.f32.mrf.mxu0 }
 0xadb   :  { %v1214_v25 = vadd.f32 %v1792_v23, %v1213_v24 }
 0xadd   :  { %1738 = vmatpush.msk.msra.mxu2 %vm412_vm13, %v1214_v25 }
 0xadf   :  { %1301 = vmatpush.msra.mxu2 %v1211_v26 }
 0xb3b   :  { %v1062_v27 = vpop.xlane.xlu2 %1061 }
 0xb3c   :  { %v1066_v29 = vsub.f32 %v1058_v15, %v1062_v27  ;;  %v1741_v15 = vld [vmem:[%s2635_s13 + $0x30] sm:$0xff] }
 0xb3e   :  { %v1068_v30 = vmul.f32 1.442695, %v1066_v29 }
 0xb40   :  { %1835 = vpow2.f32 %v1068_v30 }
 0xb43   :  { %v1065_v41 = vpop.xlane.xlu0 %1064 }
 0xb44   :  { %v1067_v31 = vsub.f32 %v1059_v19, %v1065_v41 }
 0xb46   :  { %v1836_v32 = vpop.eup %1835  ;;  %v1070_v33 = vmul.f32 1.442695, %v1067_v31 }
 0xb47   :  { %v1072_v34 = vsel %vm382_vm15, %v1836_v32, 0.0 }
 0xb48   :  { %1837 = vpow2.f32 %v1070_v33  ;;  %1073 = vadd.xlane.f32.xlu1 %v1072_v34 }
 0xb4e   :  { %v1838_v35 = vpop.eup %1837 }
 0xb4f   :  { %v1075_v38 = vsel %vm386_vm2, %v1838_v35, 0.0 }
 0xb50   :  { %1076 = vadd.xlane.f32.xlu2 %v1075_v38 }
 0xbbb   :  { %v1074_v36 = vpop.xlane.xlu1 %1073 }
 0xbbc   :  { %1839 = vrcp.f32 %v1074_v36 }
 0xbc2   :  { %v1840_v39 = vpop.eup %1839 }
 0xbc3   :  { %v1080_v40 = vmul.f32 %v1840_v39, %v1836_v32  ;;  %v1077_v42 = vpop.xlane.xlu2 %1076 }
 0xbc4   :  { %1841 = vrcp.f32 %v1077_v42  ;;  %v1752_v42 = vld [vmem:[%s2640_s17 + $0x30] sm:$0xff] }
 0xbc5   :  { %1709 = vmatmul.msk.f32.vlgmr.msrb.gmra.mxu1 %vm382_vm15, %v1080_v40  ;;  %v1753_v40 = vld [vmem:[%s2640_s17 + $0x38] sm:$0xff] }
 0xbc6   :  { %1465 = vmatpush.msrb.mxu1 %v1753_v40 }
 0xbc8   :  { %1466 = vmatpush.msrb.mxu1 %v1752_v42  ;;  %v1797_v42 = vld [vmem:[%s2641_s20 + $0x1] ss:$0 sm:$0xff] }
 0xbca   :  { %v1842_v43 = vpop.eup %1841 }
 0xbcb   :  { %v1081_v44 = vmul.f32 %v1842_v43, %v1838_v35  ;;  %v1751_v43 = vld [vmem:[%s2640_s17 + $0x28] sm:$0xff] }
 0xbcc   :  { %1467 = vmatpush.msrb.mxu1 %v1751_v43 }
 0xbcd   :  { %1710 = vmatmul.msk.f32.gmra.mxu1 %vm382_vm15, %v1081_v44  ;;  %v1750_v44 = vld [vmem:[%s2640_s17 + $0x20] sm:$0xff] }
 0xbce   :  { %1468 = vmatpush.msrb.mxu1 %v1750_v44 }
 0xbd5   :  { %1736 = vmatmul.msk.f32.vlgmr.msra.gmra.mxu1 %vm342_vm14, %v1145_v48 }
 0xbdd   :  { %1737 = vmatmul.msk.f32.gmra.mxu1 %vm342_vm14, %v1148_v51 }
 0xc42   :  { %v1108_v54 = vpop.f32.mrf.mxu1 }
 0xc43   :  { %1745 = vmatmul.msk.f32.vlgmr.msra.gmra.mxu0 %vm342_vm14, %v1108_v54 }
 0xc4a   :  { %v1111_v55 = vpop.f32.mrf.mxu1 }
 0xc4b   :  { %1746 = vmatmul.msk.f32.gmra.mxu0 %vm342_vm14, %v1111_v55 }
 0xc52   :  { %v1245_v22 = vpop.f32.mrf.mxu1 }
 0xc53   :  { %v1251_v56 = vmul.f32 0.25, %v1245_v22 }
 0xc55   :  { %v1253_v57 = vadd.f32 %v1251_v56, %v2223_v9 }
 0xc57   :  { %v1255_v58 = vsel %vm382_vm15, %v1253_v57, -inf }
 0xc58   :  { %1256 = vmax.xlane.f32.xlu0 %v1255_v58 }
 0xc5a   :  { %v1248_v28 = vpop.f32.mrf.mxu1 }
 0xc5b   :  { %v1252_v59 = vmul.f32 0.25, %v1248_v28 }
 0xc5d   :  { %v1254_v60 = vadd.f32 %v1252_v59, %v2230_v14  ;;  %v1742_v14 = vld [vmem:[%s2635_s13 + $0x38] sm:$0xff] }
 0xc5e   :  { %1332 = vmatpush.msra.mxu3 %v1742_v14 }
 0xc5f   :  { %v1258_v61 = vsel %vm386_vm2, %v1254_v60, -inf }
 0xc60   :  { %1259 = vmax.xlane.f32.xlu2 %v1258_v61  ;;  %1333 = vmatpush.msra.mxu3 %v1741_v15  ;;  %v1759_v15 = vld [vmem:[%s2642_s19 + $0x50] sm:$0xff] }
 0xcc0   :  { %v1364_v18 = vpop.f32.mrf.mxu0 }
 0xcc8   :  { %v1367_v26 = vpop.f32.mrf.mxu0 }
 0xccb   :  { %v1257_v62 = vpop.xlane.xlu0 %1256 }
 0xccc   :  { %v1261_v63 = vsub.f32 %v1253_v57, %v1257_v62 }
 0xcce   :  { %v1263_v0 = vmul.f32 1.442695, %v1261_v63 }
 0xcd0   :  { %1843 = vpow2.f32 %v1263_v0  ;;  %v1795_v0 = vld [vmem:[%s2638_s16 + $0x1] ss:$0 sm:$0xff] }
 0xcd3   :  { %v1260_v1 = vpop.xlane.xlu2 %1259 }
 0xcd4   :  { %v1262_v2 = vsub.f32 %v1254_v60, %v1260_v1  ;;  %v1794_v60 = vld [vmem:[%s2637_s15 + $0x1] ss:$0 sm:$0xff] }
 0xcd6   :  { %v1844_v3 = vpop.eup %1843  ;;  %v1265_v4 = vmul.f32 1.442695, %v1262_v2 }
 0xcd7   :  { %v1267_v9 = vsel %vm382_vm15, %v1844_v3, 0.0 }
 0xcd8   :  { %1845 = vpow2.f32 %v1265_v4  ;;  %1268 = vadd.xlane.f32.xlu1 %v1267_v9 }
 0xcde   :  { %v1846_v5 = vpop.eup %1845 }
 0xcdf   :  { %v1270_v6 = vsel %vm386_vm2, %v1846_v5, 0.0 }
 0xce0   :  { %1271 = vadd.xlane.f32.xlu0 %v1270_v6 }
 0xd4b   :  { %v1269_v7 = vpop.xlane.xlu1 %1268 }
 0xd4c   :  { %1847 = vrcp.f32 %v1269_v7 }
 0xd52   :  { %v1848_v8 = vpop.eup %1847 }
 0xd53   :  { %v1275_v10 = vmul.f32 %v1848_v8, %v1844_v3  ;;  %v1272_v11 = vpop.xlane.xlu0 %1271  ;;  %v1764_v8 = vld [vmem:[%s2642_s19 + $0x78] sm:$0xff] }
 0xd54   :  { %1849 = vrcp.f32 %v1272_v11  ;;  %1517 = vmatpush.msrb.mxu2 %v1764_v8  ;;  %v1762_v11 = vld [vmem:[%s2642_s19 + $0x68] sm:$0xff] }
 0xd55   :  { %1739 = vmatmul.msk.f32.vlgmr.msra.gmra.mxu2 %vm382_vm15, %v1275_v10  ;;  %v1763_v10 = vld [vmem:[%s2642_s19 + $0x70] sm:$0xff] }
 0xd56   :  { %1518 = vmatpush.msrb.mxu2 %v1763_v10 }
 0xd58   :  { %1519 = vmatpush.msrb.mxu2 %v1762_v11 }
 0xd5a   :  { %v1850_v12 = vpop.eup %1849 }
 0xd5b   :  { %v1276_v13 = vmul.f32 %v1850_v12, %v1846_v5  ;;  %v1761_v12 = vld [vmem:[%s2642_s19 + $0x60] sm:$0xff] }
 0xd5c   :  { %1520 = vmatpush.msrb.mxu2 %v1761_v12 }
 0xd5d   :  { %1740 = vmatmul.msk.f32.gmra.mxu2 %vm382_vm15, %v1276_v13  ;;  %v1760_v13 = vld [vmem:[%s2642_s19 + $0x58] sm:$0xff] }
 0xd5e   :  { %1521 = vmatpush.msrb.mxu2 %v1760_v13 }
 0xd60   :  { %1522 = vmatpush.msrb.mxu2 %v1759_v15 }
 0xdd8   :  { %v1303_v16 = vpop.f32.mrf.mxu2 }
 0xdd9   :  { %1743 = vmatmul.msk.f32.vlgmr.msra.gmra.mxu3 %vm342_vm14, %v1303_v16  ;;  %v1758_v16 = vld [vmem:[%s2642_s19 + $0x48] sm:$0xff] }
 0xdda   :  { %1523 = vmatpush.msrb.mxu2 %v1758_v16 }
 0xde0   :  { %v1306_v17 = vpop.f32.mrf.mxu2 }
 0xde1   :  { %1744 = vmatmul.msk.f32.gmra.mxu3 %vm342_vm14, %v1306_v17  ;;  %v1757_v17 = vld [vmem:[%s2642_s19 + $0x40] sm:$0xff] }
 0xde2   :  { %1524 = vmatpush.msrb.mxu2 %v1757_v17 }
 0xe5c   :  { %v1335_v19 = vpop.f32.mrf.mxu3 }
 0xe5d   :  { %v1365_v20 = vadd.f32 %v1364_v18, %v1335_v19  ;;  %v1796_v18 = vld [vmem:[%s2639_s18 + $0x1] ss:$0 sm:$0xff] }
 0xe5f   :  { %v1370_v23 = vadd.f32 %v1365_v20, %v2345_v47 }
 0xe61   :  { %v2526_v24 = vadd.f32 %v1793_v21, %v1370_v23 }
 0xe63   :  { %v1383_v25 = vsel %vm180_vm4, %v2526_v24, 0.0 }
 0xe64   :  { %1384 = vadd.xlane.f32.xlu1 %v1383_v25  ;;  %v1338_v27 = vpop.f32.mrf.mxu3 }
 0xe65   :  { %v1368_v29 = vadd.f32 %v1367_v26, %v1338_v27 }
 0xe67   :  { %v1371_v30 = vadd.f32 %v1368_v29, %v2350_v52 }
 0xe69   :  { %v1378_v41 = vadd.f32 %v1793_v21, %v1371_v30 }
 0xe6b   :  { %v1386_v31 = vsel %vm184_vm5, %v1378_v41, 0.0 }
 0xe6c   :  { %1387 = vadd.xlane.f32.xlu0 %v1386_v31 }
 0xed7   :  { %v1385_v32 = vpop.xlane.xlu1 %1384 }
 0xed8   :  { %v1389_v33 = vmul.f32 %v1385_v32, %v2091_v50 }
 0xeda   :  { %v1391_v47 = vsub.f32 %v2526_v24, %v1389_v33 }
 0xedc   :  { %v1393_v34 = vmul.f32 %v1391_v47, %v1391_v47 }
 0xede   :  { %v1395_v35 = vsel %vm180_vm4, %v1393_v34, 0.0 }
 0xedf   :  { %1396 = vadd.xlane.f32.xlu2 %v1395_v35  ;;  %v1388_v38 = vpop.xlane.xlu0 %1387 }
 0xee0   :  { %v1390_v36 = vmul.f32 %v1388_v38, %v2091_v50 }
 0xee2   :  { %v1392_v37 = vsub.f32 %v1378_v41, %v1390_v36 }
 0xee4   :  { %v1394_v39 = vmul.f32 %v1392_v37, %v1392_v37 }
 0xee6   :  { %v1398_v52 = vsel %vm184_vm5, %v1394_v39, 0.0 }
 0xee7   :  { %1399 = vadd.xlane.f32.xlu1 %v1398_v52 }
 0xf52   :  { %v1397_v45 = vpop.xlane.xlu2 %1396 }
 0xf53   :  { %v1401_v46 = vmul.f32 %v1397_v45, %v2091_v50 }
 0xf55   :  { %v1403_v48 = vadd.f32 1e-06, %v1401_v46 }
 0xf57   :  { %1851 = vrsqrt.f32 %v1403_v48  ;;  %vm1411_vm14 = vweird.f32 %v1403_v48 }
 0xf5a   :  { %v1400_v49 = vpop.xlane.xlu1 %1399 }
 0xf5b   :  { %v1402_v51 = vmul.f32 %v1400_v49, %v2091_v50 }
 0xf5d   :  { %v1852_v53 = vpop.eup %1851  ;;  %v1404_v54 = vadd.f32 1e-06, %v1402_v51 }
 0xf5e   :  { %v1406_v55 = vmul.f32 %v1852_v53, %v1403_v48  ;;  %vm1412_vm13 = vweird.f32 %v1852_v53 }
 0xf5f   :  { %1853 = vrsqrt.f32 %v1404_v54  ;;  %vm1413_vm15 = vmor %vm1411_vm14, %vm1412_vm13  ;;  %vm1421_vm9 = vweird.f32 %v1404_v54 }
 0xf60   :  { %v1407_v22 = vmul.f32 %v1852_v53, %v1406_v55 }
 0xf62   :  { %v1408_v56 = vmul.f32 0.5, %v1407_v22 }
 0xf64   :  { %v1409_v57 = vsub.f32 1.5, %v1408_v56 }
 0xf65   :  { %v1854_v58 = vpop.eup %1853 }
 0xf66   :  { %v1410_v28 = vmul.f32 %v1852_v53, %v1409_v57  ;;  %v1416_v59 = vmul.f32 %v1854_v58, %v1404_v54  ;;  %vm1422_vm2 = vweird.f32 %v1854_v58  ;;  %v1576_v57 = vld [vmem:[%s2646_s23 + $0x10] sm:$0xff] }
 0xf67   :  { %vm1423_vm10 = vmor %vm1421_vm9, %vm1422_vm2 }
 0xf68   :  { %v1414_v61 = vsel %vm1413_vm15, %v1852_v53, %v1410_v28  ;;  %v1417_v62 = vmul.f32 %v1854_v58, %v1416_v59  ;;  %v1574_v28 = vld [vmem:[%s2646_s23] sm:$0xff] }
 0xf69   :  { %v1425_v63 = vmul.f32 %v1414_v61, %v1391_v47 }
 0xf6a   :  { %v1418_v1 = vmul.f32 0.5, %v1417_v62 }
 0xf6b   :  { %v1430_v2 = vmul.f32 %v1794_v60, %v1425_v63 }
 0xf6c   :  { %v1419_v3 = vsub.f32 1.5, %v1418_v1 }
 0xf6d   :  { %v1435_v4 = vadd.f32 %v1795_v0, %v1430_v2 }
 0xf6e   :  { %v1420_v9 = vmul.f32 %v1854_v58, %v1419_v3 }
 0xf6f   :  { %1755 = vmatmul.msk.f32.vlgmr.msrb.gmra.mxu1 %vm180_vm4, %v1435_v4  ;;  %v1798_v4 = vld [vmem:[%s2643_s21] ss:$0 sm:$0xff] }
 0xf70   :  { %v1424_v5 = vsel %vm1423_vm10, %v1854_v58, %v1420_v9  ;;  %v1575_v58 = vld [vmem:[%s2646_s23 + $0x8] sm:$0xff] }
 0xf71   :  { %v1426_v6 = vmul.f32 %v1424_v5, %v1392_v37 }
 0xf73   :  { %v1431_v14 = vmul.f32 %v1794_v60, %v1426_v6 }
 0xf75   :  { %v1436_v7 = vadd.f32 %v1795_v0, %v1431_v14 }
 0xf77   :  { %1756 = vmatmul.msk.f32.gmra.mxu1 %vm180_vm4, %v1436_v7  ;;  %v1800_v7 = vld [vmem:[%s2645_s24] ss:$0 sm:$0xff] }
 0xfec   :  { %v1470_v19 = vpop.f32.mrf.mxu1 }
 0xfed   :  { %v1471_v20 = vadd.f32 %v1796_v18, %v1470_v19 }
 0xfef   :  { %v1476_v21 = vmul.f32 %v1471_v20, %v1471_v20 }
 0xff1   :  { %v1478_v23 = vmul.f32 %v1476_v21, %v1471_v20 }
 0xff3   :  { %v1480_v25 = vmul.f32 0.044715, %v1478_v23 }
 0xff4   :  { %v1473_v26 = vpop.f32.mrf.mxu1 }
 0xff5   :  { %v1482_v27 = vadd.f32 %v1480_v25, %v1471_v20  ;;  %v1474_v29 = vadd.f32 %v1796_v18, %v1473_v26 }
 0xff7   :  { %v1484_v30 = vmul.f32 0.7978846, %v1482_v27  ;;  %v1477_v41 = vmul.f32 %v1474_v29, %v1474_v29 }
 0xff9   :  { %1855 = vtanh.f32 %v1484_v30  ;;  %v1479_v31 = vmul.f32 %v1477_v41, %v1474_v29 }
 0xffb   :  { %v1481_v32 = vmul.f32 0.044715, %v1479_v31 }
 0xffd   :  { %v1483_v33 = vadd.f32 %v1481_v32, %v1474_v29 }
 0xfff   :  { %v1856_v47 = vpop.eup %1855  ;;  %v1485_v34 = vmul.f32 0.7978846, %v1483_v33 }
0x1000   :  { %v1488_v35 = vadd.f32 1.0, %v1856_v47 }
0x1001   :  { %1857 = vtanh.f32 %v1485_v34 }
0x1002   :  { %v1490_v38 = vmul.f32 0.5, %v1488_v35 }
0x1004   :  { %v1492_v36 = vmul.f32 %v1490_v38, %v1471_v20 }
0x1006   :  { %1765 = vmatmul.msk.f32.vlgmr.msrb.gmra.mxu2 %vm110_vm0, %v1492_v36 }
0x1007   :  { %v1858_v37 = vpop.eup %1857 }
0x1008   :  { %v1489_v39 = vadd.f32 1.0, %v1858_v37 }
0x100a   :  { %v1491_v52 = vmul.f32 0.5, %v1489_v39 }
0x100c   :  { %v1493_v40 = vmul.f32 %v1491_v52, %v1474_v29 }
0x100e   :  { %1766 = vmatmul.msk.f32.gmra.mxu2 %vm110_vm0, %v1493_v40 }
0x1089   :  { %v1526_v43 = vpop.f32.mrf.mxu2 }
0x108a   :  { %v1531_v44 = vadd.f32 %v1526_v43, %v2526_v24  ;;  %v1577_v24 = vld [vmem:[%s2646_s23 + $0x18] sm:$0xff] }
0x108b   :  { %1597 = vmatpush.msrb.mxu3 %v1577_v24 }
0x108c   :  { %v1537_v45 = vadd.f32 %v1797_v42, %v1531_v44 }
0x108d   :  { %1598 = vmatpush.msrb.mxu3 %v1576_v57 }
0x108e   :  { %v1539_v46 = vrot.slane %v1537_v45, 4 }
0x108f   :  { %1599 = vmatpush.msrb.mxu3 %v1575_v58 }
0x1090   :  { %v1541_v48 = vsel %vm170_vm1, %v1537_v45, %v1539_v46 }
0x1091   :  { %v1529_v49 = vpop.f32.mrf.mxu2  ;;  %v1544_v51 = vsel %vm184_vm5, %v1541_v48, 0.0  ;;  %1600 = vmatpush.msrb.mxu3 %v1574_v28 }
0x1092   :  { %1545 = vadd.xlane.f32.xlu2 %v1544_v51 }
0x1105   :  { %v1546_v53 = vpop.xlane.xlu2 %1545 }
0x1106   :  { %v1547_v54 = vmul.f32 %v1546_v53, %v2091_v50 }
0x1108   :  { %v1548_v55 = vsub.f32 %v1541_v48, %v1547_v54 }
0x110a   :  { %v1549_v22 = vmul.f32 %v1548_v55, %v1548_v55 }
0x110c   :  { %v1550_v56 = vsel %vm184_vm5, %v1549_v22, 0.0 }
0x110d   :  { %1551 = vadd.xlane.f32.xlu0 %v1550_v56 }
0x1180   :  { %v1552_v59 = vpop.xlane.xlu0 %1551 }
0x1181   :  { %v1553_v60 = vmul.f32 %v1552_v59, %v2091_v50  ;;  %v1799_v50 = vld [vmem:[%s2644_s22] ss:$0 sm:$0xff] }
0x1183   :  { %v1554_v61 = vadd.f32 1e-06, %v1553_v60 }
0x1185   :  { %1859 = vrsqrt.f32 %v1554_v61  ;;  %vm1561_vm1 = vweird.f32 %v1554_v61 }
0x118b   :  { %v1860_v62 = vpop.eup %1859 }
0x118c   :  { %v1556_v63 = vmul.f32 %v1860_v62, %v1554_v61  ;;  %vm1562_vm0 = vweird.f32 %v1860_v62 }
0x118d   :  { %vm1563_vm5 = vmor %vm1561_vm1, %vm1562_vm0 }
0x118e   :  { %v1557_v0 = vmul.f32 %v1860_v62, %v1556_v63 }
0x1190   :  { %v1558_v1 = vmul.f32 0.5, %v1557_v0 }
0x1192   :  { %v1559_v2 = vsub.f32 1.5, %v1558_v1 }
0x1194   :  { %v1560_v3 = vmul.f32 %v1860_v62, %v1559_v2 }
0x1196   :  { %v1564_v9 = vsel %vm1563_vm5, %v1860_v62, %v1560_v3 }
0x1197   :  { %v1565_v5 = vmul.f32 %v1564_v9, %v1548_v55 }
0x1199   :  { %v1569_v6 = vmul.f32 %v1798_v4, %v1565_v5 }
0x119b   :  { %v1573_v14 = vadd.f32 %v1799_v50, %v1569_v6 }
0x119d   :  { %1768 = vmatmul.msk.f32.vlgmr.msrb.gmra.mxu3 %vm180_vm4, %v1573_v14 }
0x1220   :  { %v1602_v8 = vpop.f32.mrf.mxu3 }
0x1221   :  { %v1603_v10 = vadd.f32 %v1800_v7, %v1602_v8 }
0x1223   :  { %v1769_v11 = vmul.f32 -1.442695, %v1603_v10 }
0x1225   :  { %1861 = vpow2.f32 %v1769_v11 }
0x122b   :  { %v1862_v12 = vpop.eup %1861 }
0x122c   :  { %v1608_v13 = vadd.f32 1.0, %v1862_v12 }
0x122e   :  { %1863 = vrcp.f32 %v1608_v13  ;;  %v1620_v18 = vand.u32 2147483648, %v1608_v13  ;;  %v1618_v20 = vand.u32 2147483647, %v1608_v13  ;;  %vm1614_vm4 = vweird.f32 %v1608_v13 }
0x1230   :  { %v1621_v23 = vor.u32 1.1754944e-38, %v1620_v18  ;;  %vm1619_vm3 = vcmp.eq.f32.partialorder %v1618_v20, 8.507059e+37 }
0x1234   :  { %v1864_v15 = vpop.eup %1863 }
0x1235   :  { %v1610_v16 = vmul.f32 %v1864_v15, %v1608_v13  ;;  %vm1615_vm11 = vweird.f32 %v1864_v15 }
0x1236   :  { %vm1616_vm12 = vmor %vm1614_vm4, %vm1615_vm11 }
0x1237   :  { %v1611_v17 = vsub.f32 1.0, %v1610_v16 }
0x1239   :  { %v1612_v19 = vmul.f32 %v1864_v15, %v1611_v17 }
0x123b   :  { %v1613_v21 = vadd.f32 %v1864_v15, %v1612_v19 }
0x123d   :  { %v1617_v25 = vsel %vm1616_vm12, %v1864_v15, %v1613_v21 }
0x123e   :  { %v1622_v26 = vsel %vm1619_vm3, %v1621_v23, %v1617_v25 }
0x123f   :  { %1624 = vst [vmem:[%s2647_s25] sm:$0x3] %v1622_v26 }

</bundles_post_ra>
